<compile_context>
chip_gen: v7x
topology: tpu7x:2x2x1
jax: 0.10.0
libtpu: 0.0.40
codegen_flags: <defaults>
</compile_context>

<pallas_src>
import functools

import jax
import jax.numpy as jnp
from jax.experimental import pallas as pl
from jax.experimental.pallas import tpu as pltpu


def _sepconv_kernel(*refs, Cpad, relu, has_bias):
    """One (batch, row-tile) grid step of depthwise3x3 + pointwise1x1 (+ Swish).

    refs (in order):
      main_ref : (1, tH, Wp+2, Cpad)    padded-input rows [t*tH, t*tH+tH)
      halo_ref : (1, 2,  Wp+2, Cpad)    padded-input rows [t*tH+tH, t*tH+tH+2)
      wf_ref   : (3, 3*Cpad, Cout_pad)  fused depthwise*pointwise weights (per kh)
      b_ref    : (1, Cout_pad) f32      pointwise bias (only when has_bias)
      out_ref  : (1, 1, tH*Wp, Cout_pad) lane-dense output slab
      col_ref  : (tH, Wp, 3*Cpad)       VMEM im2col scratch for one kh slab
    """
    if has_bias:
        main_ref, halo_ref, wf_ref, b_ref, out_ref, col_ref = refs
    else:
        main_ref, halo_ref, wf_ref, out_ref, col_ref = refs
        b_ref = None

    tH, Wp, _ = col_ref.shape

    acc = None
    for kh in range(3):
        # im2col slab for this kh: col[r, w, kw*Cpad + c] = xpad[t*tH+r+kh, w+kw, c]
        for kw in range(3):
            g = slice(kw * Cpad, (kw + 1) * Cpad)   # 128-lane aligned when Cpad%128==0
            if kh == 0:
                col_ref[:, :, g] = main_ref[0, :, kw:kw + Wp, :]
            else:
                col_ref[:tH - kh, :, g] = main_ref[0, kh:, kw:kw + Wp, :]
                col_ref[tH - kh:, :, g] = halo_ref[0, :kh, kw:kw + Wp, :]
        cols = col_ref[...].reshape(tH * Wp, 3 * Cpad)      # view: Wp % 8 == 0
        z = jnp.dot(cols, wf_ref[kh], preferred_element_type=jnp.float32)
        acc = z if acc is None else acc + z

    if has_bias:
        acc = acc + b_ref[...]                  # f32 bias, broadcast over rows
    if relu:                                    # Swish: x * sigmoid(x)
        acc = acc * jax.nn.sigmoid(acc)
    out_ref[0, 0] = acc.astype(out_ref.dtype)


def _round_up(v, m):
    return (v + m - 1) // m * m


def _vmem_budget():
    """(tile budget, vmem_limit_bytes) sized per TPU generation."""
    try:
        cap = int(pltpu.get_tpu_info().vmem_capacity_bytes)
    except Exception:                       # no device / API mismatch: be conservative
        cap = 64 * 1024 * 1024
    if cap >= 100 * 1024 * 1024:            # v5e / v6e: 128 MiB VMEM
        return 48 * 1024 * 1024, 96 * 1024 * 1024
    return 20 * 1024 * 1024, 44 * 1024 * 1024   # v7x-sized: 64 MiB per TensorCore


def _pick_tile_h(N, H, Wp, Cpad, Cout_pad, itemsize, budget):
    """Largest H-tile (multiple of 8) whose full working set fits the budget,
    then capped so the grid keeps enough steps to feed 2 TensorCores."""
    def vmem_bytes(tH):
        main_in = 2 * tH * (Wp + 2) * Cpad * itemsize       # double-buffered
        halo_in = 2 * 2 * (Wp + 2) * Cpad * itemsize
        out_b = 2 * tH * Wp * Cout_pad * itemsize
        col_b = tH * Wp * 3 * Cpad * itemsize               # single scratch slab
        wf_b = 2 * 9 * Cpad * Cout_pad * itemsize            # constant, but 2-buffered
        bias_b = 2 * Cout_pad * 4
        return main_in + halo_in + out_b + col_b + wf_b + bias_b

    h8 = _round_up(max(H, 8), 8)
    tH = 8
    for cand in range(min(h8, 512), 7, -8):
        if vmem_bytes(cand) <= budget:
            tH = cand
            break
    # Keep >= ~8 grid steps when possible (megacore sharding / pipeline depth).
    target = min(8, N * ((H + 7) // 8))
    while tH > 8 and N * ((H + tH - 1) // tH) < target:
        tH -= 8
    return tH


def separable_conv(x_nchw, dw_weight, pw_weight, pw_bias=None, relu=False,
                   tile_h=None):
    """Forward of SeparableConv.

    x_nchw   : (N, C, H, W)
    dw_weight: (C, 1, 3, 3)      -- nn.Conv2d(C, C, 3, padding=1, groups=C)
    pw_weight: (Cout, C, 1, 1)   -- nn.Conv2d(C, Cout, 1)
    pw_bias  : (Cout,) or None
    """
    N, C, H, W = x_nchw.shape
    Cout = pw_weight.shape[0]
    dtype = x_nchw.dtype
    itemsize = jnp.dtype(dtype).itemsize

    Cout_pad = _round_up(Cout, 128)
    # Lane-align the im2col column groups when the channel padding is cheap (<=2x).
    Cpad = _round_up(C, 128) if _round_up(C, 128) <= 2 * C else C
    Wp = _round_up(W, 8)                       # keeps the in-kernel reshape a view

    budget, vmem_limit = _vmem_budget()
    if tile_h is not None:
        tH = max(8, _round_up(tile_h, 8))
    else:
        tH = _pick_tile_h(N, H, Wp, Cpad, Cout_pad, itemsize, budget)
    nH = -(-H // tH)                           # cdiv
    Hpad = nH * tH

    # NHWC + single zero pad (3x3 halo, H->Hpad, W->Wp, C->Cpad). No halo gather.
    x = jnp.transpose(x_nchw, (0, 2, 3, 1))                           # (N,H,W,C)
    xp = jnp.pad(x, ((0, 0), (1, 1 + Hpad - H), (1, 1 + Wp - W), (0, Cpad - C)))
    # xp: (N, Hpad+2, Wp+2, Cpad)

    # Fused depthwise*pointwise weights, one (3*Cpad, Cout_pad) slab per kh:
    #   wf[kh, kw*Cpad + c, o] = dw[kh,kw,c] * pw[c,o]  (zero rows/cols for padding)
    dw = jnp.transpose(dw_weight[:, 0], (1, 2, 0))                    # (3,3,C)
    pw = jnp.transpose(pw_weight[:, :, 0, 0], (1, 0))                 # (C,Cout)
    wf = dw[:, :, :, None] * pw[None, None, :, :]                     # (3,3,C,Cout)
    wf = jnp.pad(wf, ((0, 0), (0, 0), (0, Cpad - C), (0, Cout_pad - Cout)))
    wf = wf.reshape(3, 3 * Cpad, Cout_pad).astype(dtype)

    has_bias = pw_bias is not None
    args = [xp, xp, wf]                        # xp twice: main rows + bottom halo
    in_specs = [
        pl.BlockSpec((1, tH, Wp + 2, Cpad), lambda b, t: (b, t, 0, 0)),
        pl.BlockSpec((1, 2, Wp + 2, Cpad),
                     lambda b, t: (b, (t + 1) * (tH // 2), 0, 0)),
        pl.BlockSpec((3, 3 * Cpad, Cout_pad), lambda b, t: (0, 0, 0)),
    ]
    if has_bias:
        args.append(jnp.pad(pw_bias.astype(jnp.float32),
                            (0, Cout_pad - Cout)).reshape(1, Cout_pad))
        in_specs.append(pl.BlockSpec((1, Cout_pad), lambda b, t: (0, 0)))

    kernel = functools.partial(_sepconv_kernel, Cpad=Cpad, relu=relu,
                               has_bias=has_bias)
    out = pl.pallas_call(
        kernel,
        out_shape=jax.ShapeDtypeStruct((N, nH, tH * Wp, Cout_pad), dtype),
        grid=(N, nH),
        in_specs=in_specs,
        out_specs=pl.BlockSpec((1, 1, tH * Wp, Cout_pad),
                               lambda b, t: (b, t, 0, 0)),
        scratch_shapes=[pltpu.VMEM((tH, Wp, 3 * Cpad), dtype)],
        compiler_params=pltpu.CompilerParams(
            dimension_semantics=("parallel", "parallel"),
            vmem_limit_bytes=vmem_limit),
    )(*args)

    out = out.reshape(N, Hpad, Wp, Cout_pad)[:, :H, :W, :Cout]        # drop padding
    # TODO(synk): fuse this slice+transpose into the consumer / keep NHWC network-wide.
    return jnp.transpose(out, (0, 3, 1, 2))                           # NCHW


def _reference(x, dw_w, pw_w, b, relu):
    """Pure-JAX reference matching torch.nn.Conv2d semantics."""
    y = jax.lax.conv_general_dilated(
        x, dw_w, (1, 1), "SAME",
        dimension_numbers=("NCHW", "OIHW", "NCHW"),
        feature_group_count=x.shape[1])
    z = jax.lax.conv_general_dilated(
        y, pw_w, (1, 1), "VALID",
        dimension_numbers=("NCHW", "OIHW", "NCHW"))
    if b is not None:
        z = z + b[None, :, None, None]
    if relu:
        z = z * jax.nn.sigmoid(z)
    return z


if __name__ == "__main__":
    # SeparableConv(in_channels=4, out_channels=8, bias=False, relu=True)
    N, C, Cout, H, W = 2, 4, 8, 16, 16

    key = jax.random.PRNGKey(0)
    kx, kd, kp, kb = jax.random.split(key, 4)
    x = jax.random.normal(kx, (N, C, H, W), jnp.float32)
    dw_weight = 0.1 * jax.random.normal(kd, (C, 1, 3, 3), jnp.float32)
    pw_weight = 0.1 * jax.random.normal(kp, (Cout, C, 1, 1), jnp.float32)

    # Module defaults (bias=False, relu=True); tile_h=8 forces the multi-tile
    # halo path (grid = (N, nH) = (2, 2)) even at this toy spatial size.
    out = separable_conv(x, dw_weight, pw_weight, None, relu=True, tile_h=8)
    out = jax.block_until_ready(out)
    ref = _reference(x, dw_weight, pw_weight, None, True)
    assert out.shape == (N, Cout, H, W), out.shape
    assert jnp.allclose(out, ref, atol=1e-4, rtol=1e-4), float(
        jnp.max(jnp.abs(out - ref)))

    # bias=True path with automatic tile selection.
    pw_bias = 0.1 * jax.random.normal(kb, (Cout,), jnp.float32)
    out2 = jax.block_until_ready(
        separable_conv(x, dw_weight, pw_weight, pw_bias, relu=False))
    ref2 = _reference(x, dw_weight, pw_weight, pw_bias, False)
    assert out2.shape == (N, Cout, H, W), out2.shape
    assert jnp.allclose(out2, ref2, atol=1e-4, rtol=1e-4), float(
        jnp.max(jnp.abs(out2 - ref2)))

    print("KERNEL_OK")
</pallas_src>

<mosaic_0001>
module attributes {stable_mosaic.version = 11 : i64} {
  func.func @_sepconv_kernel(%arg0: i32, %arg1: i32, %arg2: memref<1x8x18x4xf32, #tpu.memory_space<vmem>>, %arg3: memref<1x2x18x4xf32, #tpu.memory_space<vmem>>, %arg4: memref<3x12x128xf32, #tpu.memory_space<vmem>>, %arg5: memref<1x1x128x128xf32, #tpu.memory_space<vmem>>, %arg6: memref<8x16x12xf32, #tpu.memory_space<vmem>>) attributes {dimension_semantics = [#tpu.dimension_semantics<parallel>, #tpu.dimension_semantics<parallel>], iteration_bounds = array<i64: 2, 2>, scalar_prefetch = 0 : i64, scratch_operands = 1 : i64, tpu.core_type = #tpu.core_type<tc>, window_params = [{transform_indices = @transform_0, window_bounds = array<i64: 1, 8, 18, 4>}, {transform_indices = @transform_1, window_bounds = array<i64: 1, 2, 18, 4>}, {pipeline_mode = #tpu.pipeline_mode<synchronous>, transform_indices = @transform_2, window_bounds = array<i64: 3, 12, 128>}, {transform_indices = @transform_3, window_bounds = array<i64: 1, 1, 128, 128>}]} {
    %c0 = arith.constant 0 : index
    %c0_0 = arith.constant 0 : index
    %c0_1 = arith.constant 0 : index
    %c0_2 = arith.constant 0 : index
    %0 = vector.load %arg2[%c0, %c0_0, %c0_1, %c0_2] : memref<1x8x18x4xf32, #tpu.memory_space<vmem>>, vector<1x8x16x4xf32>
    %1 = vector.shape_cast %0 : vector<1x8x16x4xf32> to vector<8x16x4xf32>
    %c0_3 = arith.constant 0 : index
    %c0_4 = arith.constant 0 : index
    %c0_5 = arith.constant 0 : index
    %2 = vector.load %arg6[%c0_3, %c0_4, %c0_5] : memref<8x16x12xf32, #tpu.memory_space<vmem>>, vector<8x16x4xf32>
    tpu.vector_store %arg6[%c0_3, %c0_4, %c0_5], %1 {strides = array<i32>} : memref<8x16x12xf32, #tpu.memory_space<vmem>>, vector<8x16x4xf32>,
    %c0_6 = arith.constant 0 : index
    %c0_7 = arith.constant 0 : index
    %c1 = arith.constant 1 : index
    %c0_8 = arith.constant 0 : index
    %3 = vector.load %arg2[%c0_6, %c0_7, %c1, %c0_8] : memref<1x8x18x4xf32, #tpu.memory_space<vmem>>, vector<1x8x16x4xf32>
    %4 = vector.shape_cast %3 : vector<1x8x16x4xf32> to vector<8x16x4xf32>
    %c0_9 = arith.constant 0 : index
    %c0_10 = arith.constant 0 : index
    %c4 = arith.constant 4 : index
    %5 = vector.load %arg6[%c0_9, %c0_10, %c4] : memref<8x16x12xf32, #tpu.memory_space<vmem>>, vector<8x16x4xf32>
    tpu.vector_store %arg6[%c0_9, %c0_10, %c4], %4 {strides = array<i32>} : memref<8x16x12xf32, #tpu.memory_space<vmem>>, vector<8x16x4xf32>,
    %c0_11 = arith.constant 0 : index
    %c0_12 = arith.constant 0 : index
    %c2 = arith.constant 2 : index
    %c0_13 = arith.constant 0 : index
    %6 = vector.load %arg2[%c0_11, %c0_12, %c2, %c0_13] : memref<1x8x18x4xf32, #tpu.memory_space<vmem>>, vector<1x8x16x4xf32>
    %7 = vector.shape_cast %6 : vector<1x8x16x4xf32> to vector<8x16x4xf32>
    %c0_14 = arith.constant 0 : index
    %c0_15 = arith.constant 0 : index
    %c8 = arith.constant 8 : index
    %8 = vector.load %arg6[%c0_14, %c0_15, %c8] : memref<8x16x12xf32, #tpu.memory_space<vmem>>, vector<8x16x4xf32>
    tpu.vector_store %arg6[%c0_14, %c0_15, %c8], %7 {strides = array<i32>} : memref<8x16x12xf32, #tpu.memory_space<vmem>>, vector<8x16x4xf32>,
    %c0_16 = arith.constant 0 : index
    %c0_17 = arith.constant 0 : index
    %c0_18 = arith.constant 0 : index
    %9 = vector.load %arg6[%c0_16, %c0_17, %c0_18] : memref<8x16x12xf32, #tpu.memory_space<vmem>>, vector<8x16x12xf32>
    %10 = vector.shape_cast %9 : vector<8x16x12xf32> to vector<128x12xf32>
    %c0_19 = arith.constant 0 : index
    %c0_20 = arith.constant 0 : index
    %c0_21 = arith.constant 0 : index
    %11 = vector.load %arg4[%c0_19, %c0_20, %c0_21] : memref<3x12x128xf32, #tpu.memory_space<vmem>>, vector<1x12x128xf32>
    %12 = vector.shape_cast %11 : vector<1x12x128xf32> to vector<12x128xf32>
    %cst = arith.constant dense<0.000000e+00> : vector<128x128xf32>
    %13 = tpu.matmul %10, %12, %cst {dimension_numbers = #tpu.dot_dimension_numbers<[1], [0], [0], [1], [0, 0, 1, 1], [], []>} : vector<128x12xf32>, vector<12x128xf32>, vector<128x128xf32> -> vector<128x128xf32>
    %c0_22 = arith.constant 0 : index
    %c1_23 = arith.constant 1 : index
    %c0_24 = arith.constant 0 : index
    %c0_25 = arith.constant 0 : index
    %14 = vector.load %arg2[%c0_22, %c1_23, %c0_24, %c0_25] : memref<1x8x18x4xf32, #tpu.memory_space<vmem>>, vector<1x7x16x4xf32>
    %15 = vector.shape_cast %14 : vector<1x7x16x4xf32> to vector<7x16x4xf32>
    %c0_26 = arith.constant 0 : index
    %c0_27 = arith.constant 0 : index
    %c0_28 = arith.constant 0 : index
    %16 = vector.load %arg6[%c0_26, %c0_27, %c0_28] : memref<8x16x12xf32, #tpu.memory_space<vmem>>, vector<7x16x4xf32>
    tpu.vector_store %arg6[%c0_26, %c0_27, %c0_28], %15 {strides = array<i32>} : memref<8x16x12xf32, #tpu.memory_space<vmem>>, vector<7x16x4xf32>,
    %c0_29 = arith.constant 0 : index
    %c0_30 = arith.constant 0 : index
    %c0_31 = arith.constant 0 : index
    %c0_32 = arith.constant 0 : index
    %17 = vector.load %arg3[%c0_29, %c0_30, %c0_31, %c0_32] : memref<1x2x18x4xf32, #tpu.memory_space<vmem>>, vector<1x1x16x4xf32>
    %18 = vector.shape_cast %17 : vector<1x1x16x4xf32> to vector<1x16x4xf32>
    %c7 = arith.constant 7 : index
    %c0_33 = arith.constant 0 : index
    %c0_34 = arith.constant 0 : index
    %19 = vector.load %arg6[%c7, %c0_33, %c0_34] : memref<8x16x12xf32, #tpu.memory_space<vmem>>, vector<1x16x4xf32>
    tpu.vector_store %arg6[%c7, %c0_33, %c0_34], %18 {strides = array<i32>} : memref<8x16x12xf32, #tpu.memory_space<vmem>>, vector<1x16x4xf32>,
    %c0_35 = arith.constant 0 : index
    %c1_36 = arith.constant 1 : index
    %c1_37 = arith.constant 1 : index
    %c0_38 = arith.constant 0 : index
    %20 = vector.load %arg2[%c0_35, %c1_36, %c1_37, %c0_38] : memref<1x8x18x4xf32, #tpu.memory_space<vmem>>, vector<1x7x16x4xf32>
    %21 = vector.shape_cast %20 : vector<1x7x16x4xf32> to vector<7x16x4xf32>
    %c0_39 = arith.constant 0 : index
    %c0_40 = arith.constant 0 : index
    %c4_41 = arith.constant 4 : index
    %22 = vector.load %arg6[%c0_39, %c0_40, %c4_41] : memref<8x16x12xf32, #tpu.memory_space<vmem>>, vector<7x16x4xf32>
    tpu.vector_store %arg6[%c0_39, %c0_40, %c4_41], %21 {strides = array<i32>} : memref<8x16x12xf32, #tpu.memory_space<vmem>>, vector<7x16x4xf32>,
    %c0_42 = arith.constant 0 : index
    %c0_43 = arith.constant 0 : index
    %c1_44 = arith.constant 1 : index
    %c0_45 = arith.constant 0 : index
    %23 = vector.load %arg3[%c0_42, %c0_43, %c1_44, %c0_45] : memref<1x2x18x4xf32, #tpu.memory_space<vmem>>, vector<1x1x16x4xf32>
    %24 = vector.shape_cast %23 : vector<1x1x16x4xf32> to vector<1x16x4xf32>
    %c7_46 = arith.constant 7 : index
    %c0_47 = arith.constant 0 : index
    %c4_48 = arith.constant 4 : index
    %25 = vector.load %arg6[%c7_46, %c0_47, %c4_48] : memref<8x16x12xf32, #tpu.memory_space<vmem>>, vector<1x16x4xf32>
    tpu.vector_store %arg6[%c7_46, %c0_47, %c4_48], %24 {strides = array<i32>} : memref<8x16x12xf32, #tpu.memory_space<vmem>>, vector<1x16x4xf32>,
    %c0_49 = arith.constant 0 : index
    %c1_50 = arith.constant 1 : index
    %c2_51 = arith.constant 2 : index
    %c0_52 = arith.constant 0 : index
    %26 = vector.load %arg2[%c0_49, %c1_50, %c2_51, %c0_52] : memref<1x8x18x4xf32, #tpu.memory_space<vmem>>, vector<1x7x16x4xf32>
    %27 = vector.shape_cast %26 : vector<1x7x16x4xf32> to vector<7x16x4xf32>
    %c0_53 = arith.constant 0 : index
    %c0_54 = arith.constant 0 : index
    %c8_55 = arith.constant 8 : index
    %28 = vector.load %arg6[%c0_53, %c0_54, %c8_55] : memref<8x16x12xf32, #tpu.memory_space<vmem>>, vector<7x16x4xf32>
    tpu.vector_store %arg6[%c0_53, %c0_54, %c8_55], %27 {strides = array<i32>} : memref<8x16x12xf32, #tpu.memory_space<vmem>>, vector<7x16x4xf32>,
    %c0_56 = arith.constant 0 : index
    %c0_57 = arith.constant 0 : index
    %c2_58 = arith.constant 2 : index
    %c0_59 = arith.constant 0 : index
    %29 = vector.load %arg3[%c0_56, %c0_57, %c2_58, %c0_59] : memref<1x2x18x4xf32, #tpu.memory_space<vmem>>, vector<1x1x16x4xf32>
    %30 = vector.shape_cast %29 : vector<1x1x16x4xf32> to vector<1x16x4xf32>
    %c7_60 = arith.constant 7 : index
    %c0_61 = arith.constant 0 : index
    %c8_62 = arith.constant 8 : index
    %31 = vector.load %arg6[%c7_60, %c0_61, %c8_62] : memref<8x16x12xf32, #tpu.memory_space<vmem>>, vector<1x16x4xf32>
    tpu.vector_store %arg6[%c7_60, %c0_61, %c8_62], %30 {strides = array<i32>} : memref<8x16x12xf32, #tpu.memory_space<vmem>>, vector<1x16x4xf32>,
    %c0_63 = arith.constant 0 : index
    %c0_64 = arith.constant 0 : index
    %c0_65 = arith.constant 0 : index
    %32 = vector.load %arg6[%c0_63, %c0_64, %c0_65] : memref<8x16x12xf32, #tpu.memory_space<vmem>>, vector<8x16x12xf32>
    %33 = vector.shape_cast %32 : vector<8x16x12xf32> to vector<128x12xf32>
    %c1_66 = arith.constant 1 : index
    %c0_67 = arith.constant 0 : index
    %c0_68 = arith.constant 0 : index
    %34 = vector.load %arg4[%c1_66, %c0_67, %c0_68] : memref<3x12x128xf32, #tpu.memory_space<vmem>>, vector<1x12x128xf32>
    %35 = vector.shape_cast %34 : vector<1x12x128xf32> to vector<12x128xf32>
    %cst_69 = arith.constant dense<0.000000e+00> : vector<128x128xf32>
    %36 = tpu.matmul %33, %35, %cst_69 {dimension_numbers = #tpu.dot_dimension_numbers<[1], [0], [0], [1], [0, 0, 1, 1], [], []>} : vector<128x12xf32>, vector<12x128xf32>, vector<128x128xf32> -> vector<128x128xf32>
    %37 = arith.addf %13, %36 : vector<128x128xf32>
    %c0_70 = arith.constant 0 : index
    %c2_71 = arith.constant 2 : index
    %c0_72 = arith.constant 0 : index
    %c0_73 = arith.constant 0 : index
    %38 = vector.load %arg2[%c0_70, %c2_71, %c0_72, %c0_73] : memref<1x8x18x4xf32, #tpu.memory_space<vmem>>, vector<1x6x16x4xf32>
    %39 = vector.shape_cast %38 : vector<1x6x16x4xf32> to vector<6x16x4xf32>
    %c0_74 = arith.constant 0 : index
    %c0_75 = arith.constant 0 : index
    %c0_76 = arith.constant 0 : index
    %40 = vector.load %arg6[%c0_74, %c0_75, %c0_76] : memref<8x16x12xf32, #tpu.memory_space<vmem>>, vector<6x16x4xf32>
    tpu.vector_store %arg6[%c0_74, %c0_75, %c0_76], %39 {strides = array<i32>} : memref<8x16x12xf32, #tpu.memory_space<vmem>>, vector<6x16x4xf32>,
    %c0_77 = arith.constant 0 : index
    %c0_78 = arith.constant 0 : index
    %c0_79 = arith.constant 0 : index
    %c0_80 = arith.constant 0 : index
    %41 = vector.load %arg3[%c0_77, %c0_78, %c0_79, %c0_80] : memref<1x2x18x4xf32, #tpu.memory_space<vmem>>, vector<1x2x16x4xf32>
    %42 = vector.shape_cast %41 : vector<1x2x16x4xf32> to vector<2x16x4xf32>
    %c6 = arith.constant 6 : index
    %c0_81 = arith.constant 0 : index
    %c0_82 = arith.constant 0 : index
    %43 = vector.load %arg6[%c6, %c0_81, %c0_82] : memref<8x16x12xf32, #tpu.memory_space<vmem>>, vector<2x16x4xf32>
    tpu.vector_store %arg6[%c6, %c0_81, %c0_82], %42 {strides = array<i32>} : memref<8x16x12xf32, #tpu.memory_space<vmem>>, vector<2x16x4xf32>,
    %c0_83 = arith.constant 0 : index
    %c2_84 = arith.constant 2 : index
    %c1_85 = arith.constant 1 : index
    %c0_86 = arith.constant 0 : index
    %44 = vector.load %arg2[%c0_83, %c2_84, %c1_85, %c0_86] : memref<1x8x18x4xf32, #tpu.memory_space<vmem>>, vector<1x6x16x4xf32>
    %45 = vector.shape_cast %44 : vector<1x6x16x4xf32> to vector<6x16x4xf32>
    %c0_87 = arith.constant 0 : index
    %c0_88 = arith.constant 0 : index
    %c4_89 = arith.constant 4 : index
    %46 = vector.load %arg6[%c0_87, %c0_88, %c4_89] : memref<8x16x12xf32, #tpu.memory_space<vmem>>, vector<6x16x4xf32>
    tpu.vector_store %arg6[%c0_87, %c0_88, %c4_89], %45 {strides = array<i32>} : memref<8x16x12xf32, #tpu.memory_space<vmem>>, vector<6x16x4xf32>,
    %c0_90 = arith.constant 0 : index
    %c0_91 = arith.constant 0 : index
    %c1_92 = arith.constant 1 : index
    %c0_93 = arith.constant 0 : index
    %47 = vector.load %arg3[%c0_90, %c0_91, %c1_92, %c0_93] : memref<1x2x18x4xf32, #tpu.memory_space<vmem>>, vector<1x2x16x4xf32>
    %48 = vector.shape_cast %47 : vector<1x2x16x4xf32> to vector<2x16x4xf32>
    %c6_94 = arith.constant 6 : index
    %c0_95 = arith.constant 0 : index
    %c4_96 = arith.constant 4 : index
    %49 = vector.load %arg6[%c6_94, %c0_95, %c4_96] : memref<8x16x12xf32, #tpu.memory_space<vmem>>, vector<2x16x4xf32>
    tpu.vector_store %arg6[%c6_94, %c0_95, %c4_96], %48 {strides = array<i32>} : memref<8x16x12xf32, #tpu.memory_space<vmem>>, vector<2x16x4xf32>,
    %c0_97 = arith.constant 0 : index
    %c2_98 = arith.constant 2 : index
    %c2_99 = arith.constant 2 : index
    %c0_100 = arith.constant 0 : index
    %50 = vector.load %arg2[%c0_97, %c2_98, %c2_99, %c0_100] : memref<1x8x18x4xf32, #tpu.memory_space<vmem>>, vector<1x6x16x4xf32>
    %51 = vector.shape_cast %50 : vector<1x6x16x4xf32> to vector<6x16x4xf32>
    %c0_101 = arith.constant 0 : index
    %c0_102 = arith.constant 0 : index
    %c8_103 = arith.constant 8 : index
    %52 = vector.load %arg6[%c0_101, %c0_102, %c8_103] : memref<8x16x12xf32, #tpu.memory_space<vmem>>, vector<6x16x4xf32>
    tpu.vector_store %arg6[%c0_101, %c0_102, %c8_103], %51 {strides = array<i32>} : memref<8x16x12xf32, #tpu.memory_space<vmem>>, vector<6x16x4xf32>,
    %c0_104 = arith.constant 0 : index
    %c0_105 = arith.constant 0 : index
    %c2_106 = arith.constant 2 : index
    %c0_107 = arith.constant 0 : index
    %53 = vector.load %arg3[%c0_104, %c0_105, %c2_106, %c0_107] : memref<1x2x18x4xf32, #tpu.memory_space<vmem>>, vector<1x2x16x4xf32>
    %54 = vector.shape_cast %53 : vector<1x2x16x4xf32> to vector<2x16x4xf32>
    %c6_108 = arith.constant 6 : index
    %c0_109 = arith.constant 0 : index
    %c8_110 = arith.constant 8 : index
    %55 = vector.load %arg6[%c6_108, %c0_109, %c8_110] : memref<8x16x12xf32, #tpu.memory_space<vmem>>, vector<2x16x4xf32>
    tpu.vector_store %arg6[%c6_108, %c0_109, %c8_110], %54 {strides = array<i32>} : memref<8x16x12xf32, #tpu.memory_space<vmem>>, vector<2x16x4xf32>,
    %c0_111 = arith.constant 0 : index
    %c0_112 = arith.constant 0 : index
    %c0_113 = arith.constant 0 : index
    %56 = vector.load %arg6[%c0_111, %c0_112, %c0_113] : memref<8x16x12xf32, #tpu.memory_space<vmem>>, vector<8x16x12xf32>
    %57 = vector.shape_cast %56 : vector<8x16x12xf32> to vector<128x12xf32>
    %c2_114 = arith.constant 2 : index
    %c0_115 = arith.constant 0 : index
    %c0_116 = arith.constant 0 : index
    %58 = vector.load %arg4[%c2_114, %c0_115, %c0_116] : memref<3x12x128xf32, #tpu.memory_space<vmem>>, vector<1x12x128xf32>
    %59 = vector.shape_cast %58 : vector<1x12x128xf32> to vector<12x128xf32>
    %cst_117 = arith.constant dense<0.000000e+00> : vector<128x128xf32>
    %60 = tpu.matmul %57, %59, %cst_117 {dimension_numbers = #tpu.dot_dimension_numbers<[1], [0], [0], [1], [0, 0, 1, 1], [], []>} : vector<128x12xf32>, vector<12x128xf32>, vector<128x128xf32> -> vector<128x128xf32>
    %61 = arith.addf %37, %60 : vector<128x128xf32>
    %62 = arith.negf %61 : vector<128x128xf32>
    %63 = math.exp %62 : vector<128x128xf32>
    %cst_118 = arith.constant 1.000000e+00 : f32
    %64 = vector.broadcast %cst_118 : f32 to vector<128x128xf32>
    %65 = arith.addf %64, %63 : vector<128x128xf32>
    %66 = arith.divf %64, %65 : vector<128x128xf32>
    %67 = arith.mulf %61, %66 : vector<128x128xf32>
    %c0_119 = arith.constant 0 : index
    %c0_120 = arith.constant 0 : index
    %c0_121 = arith.constant 0 : index
    %c0_122 = arith.constant 0 : index
    %68 = vector.load %arg5[%c0_119, %c0_120, %c0_121, %c0_122] : memref<1x1x128x128xf32, #tpu.memory_space<vmem>>, vector<1x1x128x128xf32>
    %69 = vector.shape_cast %68 : vector<1x1x128x128xf32> to vector<128x128xf32>
    %70 = vector.shape_cast %67 : vector<128x128xf32> to vector<1x1x128x128xf32>
    tpu.vector_store %arg5[%c0_119, %c0_120, %c0_121, %c0_122], %70 {strides = array<i32>} : memref<1x1x128x128xf32, #tpu.memory_space<vmem>>, vector<1x1x128x128xf32>,
    return
  }
  func.func @transform_0(%arg0: i32, %arg1: i32) -> (i32, i32, i32, i32) {
    %c0_i32 = arith.constant 0 : i32
    %c0_i32_0 = arith.constant 0 : i32
    %c0_i32_1 = arith.constant 0 : i32
    return %arg0, %arg1, %c0_i32, %c0_i32_0 : i32, i32, i32, i32
  }
  func.func @transform_1(%arg0: i32, %arg1: i32) -> (i32, i32, i32, i32) {
    %c1_i32 = arith.constant 1 : i32
    %0 = arith.addi %arg1, %c1_i32 : i32
    %c4_i32 = arith.constant 4 : i32
    %1 = arith.muli %0, %c4_i32 : i32
    %c0_i32 = arith.constant 0 : i32
    %c0_i32_0 = arith.constant 0 : i32
    %c0_i32_1 = arith.constant 0 : i32
    return %arg0, %1, %c0_i32, %c0_i32_0 : i32, i32, i32, i32
  }
  func.func @transform_2(%arg0: i32, %arg1: i32) -> (i32, i32, i32) {
    %c0_i32 = arith.constant 0 : i32
    %c0_i32_0 = arith.constant 0 : i32
    %c0_i32_1 = arith.constant 0 : i32
    %c0_i32_2 = arith.constant 0 : i32
    return %c0_i32, %c0_i32_0, %c0_i32_1 : i32, i32, i32
  }
  func.func @transform_3(%arg0: i32, %arg1: i32) -> (i32, i32, i32, i32) {
    %c0_i32 = arith.constant 0 : i32
    %c0_i32_0 = arith.constant 0 : i32
    %c0_i32_1 = arith.constant 0 : i32
    return %arg0, %arg1, %c0_i32, %c0_i32_0 : i32, i32, i32, i32
  }
}

</mosaic_0001>

<bundles_post_ra>
// kernel: tpu_custom_call.1
= control target key start
LH: loop header
LB: loop body
LE: loop exit
PB: predicated region body
PF: predicated region fallthrough
CT: control target
= control target key end

     0   :  { %8 = vsyncpa [#allocation4], 0  ;;  %s3310_s0 = inlined_call_operand.vmem [shape: f32[2,18,18,4], index: 0, kind: input, shape index: {}]   ;;  %s3311_s1 = inlined_call_operand.vmem [shape: f32[2,18,18,4], index: 1, kind: input, shape index: {}]   ;;  %s3312_s2 = inlined_call_operand.vmem [shape: f32[3,12,128], index: 2, kind: input, shape index: {}]   ;;  %s3313_s3 = inlined_call_operand.hbm [shape: f32[2,2,128,128], index: 3, kind: output, shape index: {}]  }
   0x1   :  { %10 = vsyncpa [#allocation4 + $0x1], 0  ;;  %s2501_s12 = smov 0   ;;  %s2503_s13 = smov 0  }
   0x2   :  { %s2505_s14 = smov 0   ;;  %s2507_s15 = smov 0  }
   0x3   :  { %s2509_s16 = smov 0   ;;  %s2511_s17 = smov 0  }
   0x4   :  { %s2513_s18 = smov 0   ;;  %s2515_s19 = smov 0  }
   0x5 LB: > { %s1871_s20 = sadd.s32 4294967295, %s2474_s19   ;;  %s1872_s21 = sadd.s32 4294967294, %s2474_s19   ;;  %s2474_s19 = sphi %s2515_s19, %s16_s19   ;;  %s2470_s18 = sphi %s2513_s18, %s3324_s18   ;;  %s2466_s17 = sphi %s2511_s17, %s3323_s17   ;;  %s2462_s16 = sphi %s2509_s16, %s3322_s16   ;;  %s2458_s15 = sphi %s2507_s15, %s3321_s15   ;;  %s2454_s14 = sphi %s2505_s14, %s3320_s14   ;;  %s2450_s13 = sphi %s2503_s13, %s3319_s13   ;;  %s2446_s12 = sphi %s2501_s12, %s3318_s12  }
   0x6   : > { %s25_s22 = sadd.s32 1, %s2466_s17  ;;  %s28_s23 = sadd.s32 1, %s2470_s18 }
   0x7   : > { %p26_p0 = scmp.ge.s32.totalorder %s25_s22, 2  ;;  %p128_p1 = scmp.ne.s32.totalorder %s2454_s14, %s2450_s13 }
   0x8   : > { %p129_p2 = scmp.eq.s32.totalorder %s1871_s20, 3  ;;  %p134_p5 = scmp.ne.s32.totalorder %s2450_s13, %s2446_s12 }
   0x9   : > { %s3326_s22 = smov (%p26_p0, %s25_s22), 0  ;;  %s3328_s23 = smov (!%p26_p0, %s28_s23), %s2470_s18 }
   0xa   : > { %s114_s24 = ssub.s32 %s2466_s17, %s3326_s22  ;;  %p2552_p3 = por %p129_p2, %p128_p1 }
   0xb   : > { %p30_p4 = scmp.ge.s32.totalorder %s3328_s23, 2  ;;  %p135_p6 = scmp.eq.s32.totalorder %s1872_s21, 3 }
   0xc   : > { %p1877_p7 = scmp.ge.s32.totalorder %s2474_s19, 1  ;;  %p198_p9 = scmp.lt.s32.totalorder %s2474_s19, 5 }
   0xd   : > { %s3330_s23 = smov (%p30_p4, %s3328_s23), 0  ;;  %p2561_p8 = por %p135_p6, %p134_p5 }
   0xe   : > { %s113_s27 = ssub.s32 %s2470_s18, %s3330_s23  ;;  %s118_s28 = sadd.s32 1, %s2454_s14 }
   0xf   : > { %s115_s29 = sor.u32 %s114_s24, %s113_s27  ;;  %p199_p10 = pnand %p1877_p7, %p198_p9 }
  0x10   : > { %p116_p11 = scmp.eq.s32.totalorder %s115_s29, 0  ;;  %s2573_s4 = sshll.u32 (!%p199_p10), %s2458_s15, 3  ;;  %v523_v0 = vld [vmem:[%s3312_s2] sm:$0xff] (!%p199_p10)  ;;  %v524_v1 = vld [vmem:[%s3312_s2 + $0x8] sm:$0xf] (!%p199_p10)  ;;  %vm819_vm0 = vcmask (!%p199_p10), 1043456  }
  0x11   : > { %202 = sbr.rel (%p199_p10) target bundleno = 604 (0x25c), region = 32  ;;  %p250_p12 = scmp.lt.s32.totalorder (!%p199_p10), %s2462_s16, 1  ;;  %v2588_v2 = vpack.c.bf16 (!%p199_p10), %v524_v1, %v523_v0  ;;  %vm2476_vm1 = vmmov (!%p199_p10), 1   ;;  %vm296_vm3 = vcmask (!%p199_p10), 31744   ;;  %v1926_v24 = vld [vmem:[%s3312_s2 + $0x10] sm:$0xff] (!%p199_p10)  ;;  %v1998_v51 = vld [vmem:[%s3312_s2 + $0x20] sm:$0xff] (!%p199_p10) }
  0x12   : > { %s2570_s30 = scalar_select %p116_p11, %s2454_s14, %s118_s28  }
  0x13   : > { %p252_p13 = scmp.lt.s32.totalorder (!%p199_p10), %s2573_s4, 17  ;;  %vm2590_vm2 = vmpackc.low (!%p199_p10), %vm819_vm0, %vm2476_vm1  ;;  %s2478_s8 = smov (!%p199_p10), 4   ;;  %v1927_v25 = vld [vmem:[%s3312_s2 + $0x18] sm:$0xf] (!%p199_p10)  ;;  %v1999_v52 = vld [vmem:[%s3312_s2 + $0x28] sm:$0xf] (!%p199_p10) }
  0x14   : > { %2194 = vmatprep.subr.msk.bf16.mxu0 (!%p199_p10), %vm2590_vm2, %v2588_v2  ;;  %s2047_s9 = sadd.s32 (!%p199_p10), 8, %s2573_s4  ;;  %v2186_v26 = vpack.c.bf16 (!%p199_p10), %v1927_v25, %v1926_v24  ;;  %v2198_v53 = vpack.c.bf16 (!%p199_p10), %v1999_v52, %v1998_v51  ;;  %vm393_vm4 = vcmask (!%p199_p10), 64544   ;;  %vm490_vm5 = vcmask (!%p199_p10), 97344   ;;  %s2034_s11 = sshll.u32 (!%p199_p10), %s2458_s15, 4 }
  0x15   : > { %2197 = vmatpush3.bf16.msk.msra.mxu0 (!%p199_p10), %vm2590_vm2, %v2588_v2  ;;  %p270_p0 = scmp.lt.s32.totalorder (!%p199_p10), %s2047_s9, 17  ;;  %vm770_vm6 = vcmask (!%p199_p10), 97280  }
  0x16   : > { %2188 = vmatprep.subr.msk.bf16.mxu1 (!%p199_p10), %vm2590_vm2, %v2186_v26  ;;  %2200 = vmatprep.subr.msk.bf16.mxu0 (!%p199_p10), %vm2590_vm2, %v2198_v53 }
  0x17   : > { %2191 = vmatpush3.bf16.msk.msra.mxu1 (!%p199_p10), %vm2590_vm2, %v2186_v26 }
  0x18   : > { %s2578_s5 = scalar_select %p250_p12, %s2462_s16, 1  ;;  %2204 = vmatprep.subr.msk.bf16.mxu1 %vm2590_vm2, %v2588_v2 }
  0x19   : > { %s253_s6 = scalar_select %p252_p13, %s2573_s4, 17 }
  0x1a   : > { %s2239_s7 = smul.u32 54, %s2578_s5  ;;  %s3332_s9 = smov (!%p270_p0, %s2047_s9), 17 }
  0x1b   : > { %s2238_s20 = smul.u32 3, %s253_s6  ;;  %s2477_s6 = smov 8  }
  0x1c   : > { %s2240_s4 = smul.u32 3, %s3332_s9 }
  0x1d   : > { %s256_s21 = sadd.s32 %s2239_s7, %s2238_s20  ;;  %s2035_s20 = sshll.u32 %s2462_s16, 5 }
  0x1e   : > { %s1880_s24 = sshll.u32 %s256_s21, 3  ;;  %s2656_s10 = sadd.s32 %s2240_s4, %s2239_s7 }
  0x1f   : > { %s2605_s29 = scalar_lea.vmem %s3310_s0, %s1880_s24  ;;  %s1762_s21 = sadd.s32 %s2035_s20, %s2034_s11 }
  0x20   : > { %v410_v4 = vld [vmem:[%s2605_s29 + $0x2] sm:$0xff]  ;;  %v411_v6 = vld [vmem:[%s2605_s29 + $0xa] sm:$0xff]  ;;  %v315_v9 = vld [vmem:[%s2605_s29 + $0x19] sm:$0xff]  ;;  %s2036_s24 = sshll.u32 %s1762_s21, 7  ;;  %s2479_s4 = smov [#allocation3]  }
  0x21   : > { %v313_v5 = vld [vmem:[%s2605_s29 + $0x1] sm:$0xff]  ;;  %442 = vrot.lane.b32.xlu1 %v410_v4, %s2477_s6  ;;  %v314_v7 = vld [vmem:[%s2605_s29 + $0x9] sm:$0xff]  ;;  %v2629_v15 = vld [vmem:[%s2605_s29 + $0x18] sm:$0xff]  ;;  %s3249_s15 = scalar_lea.hbm %s3313_s3, %s2036_s24 }
  0x22   : > { %345 = vrot.lane.b32.xlu0 %v313_v5, %s2478_s8  ;;  %v316_v8 = vld [vmem:[%s2605_s29 + $0x21] sm:$0xff]  ;;  %299 = vst.msk [vmem:[#allocation2 + $0x10] sm:$0xff] %vm296_vm3, %v2629_v15  ;;  %v2639_v16 = vld [vmem:[%s2605_s29 + $0x38] sm:$0xff]  ;;  %v2642_v17 = vld [vmem:[%s2605_s29 + $0x30] sm:$0xff] }
  0x23   : > { %v413_v10 = vld [vmem:[%s2605_s29 + $0x22] sm:$0xff]  ;;  %v412_v11 = vld [vmem:[%s2605_s29 + $0x1a] sm:$0xff]  ;;  %v2648_v19 = vld [vmem:[%s2605_s29 + $0x31] sm:$0xff]  ;;  %302 = vst.msk [vmem:[#allocation2 + $0x28] sm:$0xff] %vm296_vm3, %v2639_v16 }
  0x24   : > { %v280_v12 = vld [vmem:[%s2605_s29] sm:$0xff]  ;;  %v281_v13 = vld [vmem:[%s2605_s29 + $0x8] sm:$0xff]  ;;  %301 = vst.msk [vmem:[#allocation2 + $0x20] sm:$0xff] %vm296_vm3, %v2642_v17  ;;  %v2671_v22 = vld [vmem:[%s2605_s29 + $0x32] sm:$0xff] }
  0x25   : > { %444 = vrot.lane.b32.xlu1 %v411_v6, %s2477_s6  ;;  %297 = vst.msk [vmem:[#allocation2] sm:$0xff] %vm296_vm3, %v280_v12  ;;  %v2626_v14 = vld [vmem:[%s2605_s29 + $0x20] sm:$0xff]  ;;  %298 = vst.msk [vmem:[#allocation2 + $0x8] sm:$0xff] %vm296_vm3, %v281_v13  ;;  %v2659_v20 = vld [vmem:[%s2605_s29 + $0x48] sm:$0xff] }
  0x26   : > { %347 = vrot.lane.b32.xlu0 %v314_v7, %s2478_s8  ;;  %300 = vst.msk [vmem:[#allocation2 + $0x18] sm:$0xff] %vm296_vm3, %v2626_v14  ;;  %v2645_v18 = vld [vmem:[%s2605_s29 + $0x39] sm:$0xff]  ;;  %303 = vst.msk [vmem:[#allocation2 + $0x30] sm:$0xff] %vm296_vm3, %v2659_v20  ;;  %v2674_v23 = vld [vmem:[%s2605_s29 + $0x50] sm:$0xff] }
  0x27   : > { %v2668_v21 = vld [vmem:[%s2605_s29 + $0x3a] sm:$0xff]  ;;  %304 = vst.msk [vmem:[#allocation2 + $0x38] sm:$0xff] %vm296_vm3, %v2674_v23  ;;  %v2691_v27 = vld [vmem:[%s2605_s29 + $0x49] sm:$0xff]  ;;  %v2704_v28 = vld [vmem:[%s2605_s29 + $0x51] sm:$0xff] }
  0x28   : > { %v2707_v29 = vld [vmem:[%s2605_s29 + $0x60] sm:$0xff]  ;;  %v2715_v30 = vld [vmem:[%s2605_s29 + $0x52] sm:$0xff]  ;;  %v2718_v31 = vld [vmem:[%s2605_s29 + $0x4a] sm:$0xff] }
  0x29   : > { %351 = vrot.lane.b32.xlu1 %v316_v8, %s2478_s8  ;;  %305 = vst.msk [vmem:[#allocation2 + $0x40] sm:$0xff] %vm296_vm3, %v2707_v29  ;;  %v2721_v32 = vld [vmem:[%s2605_s29 + $0x68] sm:$0xff]  ;;  %v2744_v35 = vld [vmem:[%s2605_s29 + $0x78] sm:$0xff]  ;;  %v2759_v38 = vld [vmem:[%s2605_s29 + $0x80] sm:$0xff] }
  0x2a   : > { %349 = vrot.lane.b32.xlu0 %v315_v9, %s2478_s8  ;;  %306 = vst.msk [vmem:[#allocation2 + $0x48] sm:$0xff] %vm296_vm3, %v2721_v32  ;;  %v2734_v33 = vld [vmem:[%s2605_s29 + $0x61] sm:$0xff]  ;;  %v2741_v34 = vld [vmem:[%s2605_s29 + $0x69] sm:$0xff]  ;;  %307 = vst.msk [vmem:[#allocation2 + $0x50] sm:$0xff] %vm296_vm3, %v2744_v35 }
  0x2b   : > { %v2753_v36 = vld [vmem:[%s2605_s29 + $0x6a] sm:$0xff]  ;;  %v2756_v37 = vld [vmem:[%s2605_s29 + $0x62] sm:$0xff]  ;;  %308 = vst.msk [vmem:[#allocation2 + $0x58] sm:$0xff] %vm296_vm3, %v2759_v38  ;;  %v2772_v39 = vld [vmem:[%s2605_s29 + $0x79] sm:$0xff] }
  0x2c   : > { %v2779_v40 = vld [vmem:[%s2605_s29 + $0x81] sm:$0xff]  ;;  %v2782_v41 = vld [vmem:[%s2605_s29 + $0x90] sm:$0xff]  ;;  %v2797_v44 = vld [vmem:[%s2605_s29 + $0x98] sm:$0xff] }
  0x2d   : > { %448 = vrot.lane.b32.xlu1 %v413_v10, %s2477_s6  ;;  %309 = vst.msk [vmem:[#allocation2 + $0x60] sm:$0xff] %vm296_vm3, %v2782_v41  ;;  %v2791_v42 = vld [vmem:[%s2605_s29 + $0x82] sm:$0xff]  ;;  %v2794_v43 = vld [vmem:[%s2605_s29 + $0x7a] sm:$0xff]  ;;  %310 = vst.msk [vmem:[#allocation2 + $0x68] sm:$0xff] %vm296_vm3, %v2797_v44 }
  0x2e   : > { %446 = vrot.lane.b32.xlu0 %v412_v11, %s2477_s6  ;;  %v2810_v45 = vld [vmem:[%s2605_s29 + $0x91] sm:$0xff]  ;;  %v2817_v46 = vld [vmem:[%s2605_s29 + $0x99] sm:$0xff]  ;;  %v2834_v49 = vld [vmem:[%s2605_s29 + $0xa8] sm:$0xff] }
  0x2f   : > { %v2824_v47 = vld [vmem:[%s2605_s29 + $0x9a] sm:$0xff]  ;;  %v2827_v48 = vld [vmem:[%s2605_s29 + $0x92] sm:$0xff]  ;;  %311 = vst.msk [vmem:[#allocation2 + $0x70] sm:$0xff] %vm296_vm3, %v2834_v49  ;;  %v2862_v54 = vld [vmem:[%s2605_s29 + $0xa9] sm:$0xff] }
  0x30   : > { %v2843_v50 = vld [vmem:[%s2605_s29 + $0xb0] sm:$0xff] }
  0x31   : > { %355 = vrot.lane.b32.xlu1 %v2645_v18, %s2478_s8  ;;  %312 = vst.msk [vmem:[#allocation2 + $0x78] sm:$0xff] %vm296_vm3, %v2843_v50  ;;  %v2871_v55 = vld [vmem:[%s2605_s29 + $0xb1] sm:$0xff] }
  0x32   : > { %353 = vrot.lane.b32.xlu0 %v2648_v19, %s2478_s8  ;;  %v2878_v56 = vld [vmem:[%s2605_s29 + $0xb2] sm:$0xff]  ;;  %v2881_v57 = vld [vmem:[%s2605_s29 + $0xaa] sm:$0xff]  ;;  %s1883_s29 = sshll.u32 %s2656_s10, 3 }
  0x33   : > { %s2945_s10 = scalar_lea.vmem %s3311_s1, %s1883_s29 }
  0x34   : > { %v2972_v24 = vld [vmem:[%s2945_s10 + $0x9] sm:$0xff] }
  0x35   : > { %452 = vrot.lane.b32.xlu1 %v2668_v21, %s2477_s6 }
  0x36   : > { %450 = vrot.lane.b32.xlu0 %v2671_v22, %s2477_s6 }
  0x39   : > { %589 = vrot.lane.b32.xlu1 %v316_v8, %s2478_s8 }
  0x3a   : > { %587 = vrot.lane.b32.xlu0 %v315_v9, %s2478_s8 }
  0x3d   : > { %357 = vrot.lane.b32.xlu1 %v2691_v27, %s2478_s8 }
  0x3e   : > { %683 = vrot.lane.b32.xlu0 %v412_v11, %s2477_s6 }
  0x41   : > { %359 = vrot.lane.b32.xlu1 %v2704_v28, %s2478_s8 }
  0x42   : > { %685 = vrot.lane.b32.xlu0 %v413_v10, %s2477_s6 }
  0x45   : > { %456 = vrot.lane.b32.xlu1 %v2715_v30, %s2477_s6 }
  0x46   : > { %454 = vrot.lane.b32.xlu0 %v2718_v31, %s2477_s6 }
  0x49   : > { %593 = vrot.lane.b32.xlu1 %v2645_v18, %s2478_s8 }
  0x4a   : > { %591 = vrot.lane.b32.xlu0 %v2648_v19, %s2478_s8 }
  0x4d   : > { %361 = vrot.lane.b32.xlu1 %v2734_v33, %s2478_s8 }
  0x4e   : > { %687 = vrot.lane.b32.xlu0 %v2671_v22, %s2477_s6 }
  0x51   : > { %363 = vrot.lane.b32.xlu1 %v2741_v34, %s2478_s8 }
  0x52   : > { %689 = vrot.lane.b32.xlu0 %v2668_v21, %s2477_s6 }
  0x55   : > { %460 = vrot.lane.b32.xlu1 %v2753_v36, %s2477_s6 }
  0x56   : > { %458 = vrot.lane.b32.xlu0 %v2756_v37, %s2477_s6 }
  0x59   : > { %597 = vrot.lane.b32.xlu1 %v2704_v28, %s2478_s8 }
  0x5a   : > { %595 = vrot.lane.b32.xlu0 %v2691_v27, %s2478_s8 }
  0x5d   : > { %365 = vrot.lane.b32.xlu1 %v2772_v39, %s2478_s8 }
  0x5e   : > { %691 = vrot.lane.b32.xlu0 %v2718_v31, %s2477_s6 }
  0x61   : > { %367 = vrot.lane.b32.xlu1 %v2779_v40, %s2478_s8 }
  0x62   : > { %693 = vrot.lane.b32.xlu0 %v2715_v30, %s2477_s6 }
  0x65   : > { %464 = vrot.lane.b32.xlu1 %v2791_v42, %s2477_s6 }
  0x66   : > { %462 = vrot.lane.b32.xlu0 %v2794_v43, %s2477_s6 }
  0x69   : > { %601 = vrot.lane.b32.xlu1 %v2741_v34, %s2478_s8 }
  0x6a   : > { %599 = vrot.lane.b32.xlu0 %v2734_v33, %s2478_s8 }
  0x6d   : > { %369 = vrot.lane.b32.xlu1 %v2810_v45, %s2478_s8 }
  0x6e   : > { %695 = vrot.lane.b32.xlu0 %v2756_v37, %s2477_s6 }
  0x71   : > { %371 = vrot.lane.b32.xlu1 %v2817_v46, %s2478_s8 }
  0x72   : > { %697 = vrot.lane.b32.xlu0 %v2753_v36, %s2477_s6 }
  0x75   : > { %468 = vrot.lane.b32.xlu1 %v2824_v47, %s2477_s6 }
  0x76   : > { %466 = vrot.lane.b32.xlu0 %v2827_v48, %s2477_s6 }
  0x79   : > { %1222 = vrot.lane.b32.xlu1 %v2648_v19, %s2478_s8 }
  0x7a   : > { %603 = vrot.lane.b32.xlu0 %v2772_v39, %s2478_s8 }
  0x7d   : > { %699 = vrot.lane.b32.xlu1 %v2794_v43, %s2477_s6 }
  0x7e   : > { %605 = vrot.lane.b32.xlu0 %v2779_v40, %s2478_s8 }
  0x81   : > { %1318 = vrot.lane.b32.xlu1 %v2671_v22, %s2477_s6  ;;  %v2969_v22 = vld [vmem:[%s2945_s10 + $0x2] sm:$0xff] }
  0x82   : > { %1224 = vrot.lane.b32.xlu0 %v2645_v18, %s2478_s8 }
  0x85   : > { %701 = vrot.lane.b32.xlu1 %v2791_v42, %s2477_s6 }
  0x86   : > { %373 = vrot.lane.b32.xlu0 %v2862_v54, %s2478_s8 }
  0x89   : > { %375 = vrot.lane.b32.xlu1 %v2871_v55, %s2478_s8 }
  0x8a   : > { %1320 = vrot.lane.b32.xlu0 %v2668_v21, %s2477_s6 }
  0x8d   : > { %472 = vrot.lane.b32.xlu1 %v2878_v56, %s2477_s6 }
  0x8e   : > { %470 = vrot.lane.b32.xlu0 %v2881_v57, %s2477_s6 }
  0x91   : > { %1226 = vrot.lane.b32.xlu1 %v2691_v27, %s2478_s8 }
  0x92   : > { %607 = vrot.lane.b32.xlu0 %v2810_v45, %s2478_s8 }
  0x93   : > { %v443_v58 = vpop.permute.xlu1 %442 }
  0x94   : > { %v346_v59 = vpop.permute.xlu0 %345 }
  0x95   : > { %394 = vst.msk [vmem:[#allocation2] sm:$0xff] %vm393_vm4, %v346_v59  ;;  %703 = vrot.lane.b32.xlu1 %v2827_v48, %s2477_s6  ;;  %v1368_v59 = vld [vmem:[%s2945_s10 + $0x1a] sm:$0xff] }
  0x96   : > { %491 = vst.msk [vmem:[#allocation2] sm:$0xff] %vm490_vm5, %v443_v58  ;;  %609 = vrot.lane.b32.xlu0 %v2817_v46, %s2478_s8  ;;  %v1273_v58 = vld [vmem:[%s2945_s10 + $0x21] sm:$0xff] }
  0x97   : > { %v445_v60 = vpop.permute.xlu1 %444 }
  0x98   : > { %v348_v61 = vpop.permute.xlu0 %347 }
  0x99   : > { %395 = vst.msk [vmem:[#allocation2 + $0x8] sm:$0xff] %vm393_vm4, %v348_v61  ;;  %1322 = vrot.lane.b32.xlu1 %v2718_v31, %s2477_s6  ;;  %v740_v31 = vld [vmem:[%s2945_s10 + $0xa] sm:$0xff] }
  0x9a   : > { %492 = vst.msk [vmem:[#allocation2 + $0x8] sm:$0xff] %vm490_vm5, %v445_v60  ;;  %1228 = vrot.lane.b32.xlu0 %v2704_v28, %s2478_s8 }
  0x9b   : > { %v352_v62 = vpop.permute.xlu1 %351 }
  0x9c   : > { %v350_v63 = vpop.permute.xlu0 %349  ;;  %397 = vst.msk [vmem:[#allocation2 + $0x18] sm:$0xff] %vm393_vm4, %v352_v62 }
  0x9d   : > { %396 = vst.msk [vmem:[#allocation2 + $0x10] sm:$0xff] %vm393_vm4, %v350_v63  ;;  %v507_v0 = vld [vmem:[#allocation2] sm:$0xff]  ;;  %1324 = vrot.lane.b32.xlu1 %v2715_v30, %s2477_s6 }
  0x9e   : > { %705 = vrot.lane.b32.xlu0 %v2824_v47, %s2477_s6  ;;  %540 = vst.msk [vmem:[#allocation2] sm:$0xff] %vm296_vm3, %v2629_v15  ;;  %2134 = vmatprep.mubr.msk.f32.mxu0 %vm770_vm6, %v507_v0  ;;  %v1369_v63 = vld [vmem:[%s2945_s10 + $0x22] sm:$0xff] }
  0x9f   : > { %v449_v1 = vpop.permute.xlu1 %448 }
  0xa0   : > { %v447_v4 = vpop.permute.xlu0 %446  ;;  %494 = vst.msk [vmem:[#allocation2 + $0x18] sm:$0xff] %vm490_vm5, %v449_v1 }
  0xa1   : > { %493 = vst.msk [vmem:[#allocation2 + $0x10] sm:$0xff] %vm490_vm5, %v447_v4  ;;  %v508_v5 = vld [vmem:[#allocation2 + $0x8] sm:$0xff]  ;;  %1230 = vrot.lane.b32.xlu1 %v2734_v33, %s2478_s8 }
  0xa2   : > { %611 = vrot.lane.b32.xlu0 %v2862_v54, %s2478_s8  ;;  %541 = vst.msk [vmem:[#allocation2 + $0x8] sm:$0xff] %vm296_vm3, %v2626_v14  ;;  %2135 = vmatmul.mubr.msk.f32.vlgmr.msra.gmra.mrb[0].mxu0 %vm770_vm6, %v508_v5  ;;  %v2954_v14 = vld [vmem:[%s2945_s10 + $0x1] sm:$0xff] }
  0xa3   : > { %v356_v6 = vpop.permute.xlu1 %355  ;;  %2203 = vmatpush3.bf16.msk.msra.mxu0 %vm2590_vm2, %v2198_v53 }
  0xa4   : > { %v354_v7 = vpop.permute.xlu0 %353  ;;  %399 = vst.msk [vmem:[#allocation2 + $0x28] sm:$0xff] %vm393_vm4, %v356_v6 }
  0xa5   : > { %398 = vst.msk [vmem:[#allocation2 + $0x20] sm:$0xff] %vm393_vm4, %v354_v7  ;;  %707 = vrot.lane.b32.xlu1 %v2881_v57, %s2477_s6 }
  0xa6   : > { %613 = vrot.lane.b32.xlu0 %v2871_v55, %s2478_s8 }
  0xa7   : > { %v453_v8 = vpop.permute.xlu1 %452  ;;  %v510_v11 = vld [vmem:[#allocation2 + $0x18] sm:$0xff] }
  0xa8   : > { %v451_v9 = vpop.permute.xlu0 %450  ;;  %v509_v10 = vld [vmem:[#allocation2 + $0x10] sm:$0xff]  ;;  %496 = vst.msk [vmem:[#allocation2 + $0x28] sm:$0xff] %vm490_vm5, %v453_v8 }
  0xa9   : > { %495 = vst.msk [vmem:[#allocation2 + $0x20] sm:$0xff] %vm490_vm5, %v451_v9  ;;  %2137 = vmatprep.mubr.msk.f32.mxu0 %vm770_vm6, %v509_v10  ;;  %1326 = vrot.lane.b32.xlu1 %v2756_v37, %s2477_s6 }
  0xaa   : > { %543 = vst.msk [vmem:[#allocation2 + $0x18] sm:$0xff] %vm296_vm3, %v2639_v16  ;;  %542 = vst.msk [vmem:[#allocation2 + $0x10] sm:$0xff] %vm296_vm3, %v2642_v17  ;;  %1232 = vrot.lane.b32.xlu0 %v2741_v34, %s2478_s8  ;;  %2138 = vmatmul.mubr.msk.f32.gmra.mrb[2].mxu0 %vm770_vm6, %v510_v11 }
  0xab   : > { %v590_v12 = vpop.permute.xlu1 %589 }
  0xac   : > { %v588_v13 = vpop.permute.xlu0 %587  ;;  %630 = vst.msk [vmem:[#allocation2 + $0x8] sm:$0xff] %vm393_vm4, %v590_v12 }
  0xad   : > { %629 = vst.msk [vmem:[#allocation2] sm:$0xff] %vm393_vm4, %v588_v13  ;;  %1328 = vrot.lane.b32.xlu1 %v2753_v36, %s2477_s6 }
  0xae   : > { %709 = vrot.lane.b32.xlu0 %v2878_v56, %s2477_s6 }
  0xaf   : > { %v358_v15 = vpop.permute.xlu1 %357  ;;  %v512_v21 = vld [vmem:[#allocation2 + $0x28] sm:$0xff] }
  0xb0   : > { %v684_v18 = vpop.permute.xlu0 %683  ;;  %v511_v19 = vld [vmem:[#allocation2 + $0x20] sm:$0xff]  ;;  %400 = vst.msk [vmem:[#allocation2 + $0x30] sm:$0xff] %vm393_vm4, %v358_v15 }
  0xb1   : > { %725 = vst.msk [vmem:[#allocation2] sm:$0xff] %vm490_vm5, %v684_v18  ;;  %2140 = vmatprep.mubr.msk.f32.mxu0 %vm770_vm6, %v511_v19  ;;  %1234 = vrot.lane.b32.xlu1 %v2772_v39, %s2478_s8 }
  0xb2   : > { %545 = vst.msk [vmem:[#allocation2 + $0x28] sm:$0xff] %vm296_vm3, %v2674_v23  ;;  %544 = vst.msk [vmem:[#allocation2 + $0x20] sm:$0xff] %vm296_vm3, %v2659_v20  ;;  %647 = vrot.lane.b32.xlu0 %v2954_v14, %s2478_s8  ;;  %2141 = vmatmul.mubr.msk.f32.gmra.mrb[4].mxu0 %vm770_vm6, %v512_v21 }
  0xb3   : > { %v360_v25 = vpop.permute.xlu1 %359 }
  0xb4   : > { %v686_v26 = vpop.permute.xlu0 %685  ;;  %401 = vst.msk [vmem:[#allocation2 + $0x38] sm:$0xff] %vm393_vm4, %v360_v25 }
  0xb5   : > { %726 = vst.msk [vmem:[#allocation2 + $0x8] sm:$0xff] %vm490_vm5, %v686_v26  ;;  %743 = vrot.lane.b32.xlu1 %v2969_v22, %s2477_s6 }
  0xb6   : > { %649 = vrot.lane.b32.xlu0 %v2972_v24, %s2478_s8 }
  0xb7   : > { %v457_v27 = vpop.permute.xlu1 %456 }
  0xb8   : > { %v455_v28 = vpop.permute.xlu0 %454  ;;  %v751_v30 = vld [vmem:[#allocation2] sm:$0xff]  ;;  %498 = vst.msk [vmem:[#allocation2 + $0x38] sm:$0xff] %vm490_vm5, %v457_v27 }
  0xb9   : > { %497 = vst.msk [vmem:[#allocation2 + $0x30] sm:$0xff] %vm490_vm5, %v455_v28  ;;  %2106 = vmatprep.mubr.msk.f32.mxu1 %vm770_vm6, %v751_v30  ;;  %1330 = vrot.lane.b32.xlu1 %v2794_v43, %s2477_s6 }
  0xba   : > { %1177 = vst.msk [vmem:[#allocation2] sm:$0xff] %vm296_vm3, %v2642_v17  ;;  %1236 = vrot.lane.b32.xlu0 %v2779_v40, %s2478_s8 }
  0xbb   : > { %v594_v33 = vpop.permute.xlu1 %593 }
  0xbc   : > { %v592_v34 = vpop.permute.xlu0 %591  ;;  %v752_v36 = vld [vmem:[#allocation2 + $0x8] sm:$0xff]  ;;  %632 = vst.msk [vmem:[#allocation2 + $0x18] sm:$0xff] %vm393_vm4, %v594_v33  ;;  %v554_v33 = vld [vmem:[%s2945_s10] sm:$0xff] }
  0xbd   : > { %631 = vst.msk [vmem:[#allocation2 + $0x10] sm:$0xff] %vm393_vm4, %v592_v34  ;;  %2107 = vmatmul.mubr.msk.f32.vlgmr.msra.gmra.mrb[0].mxu1 %vm770_vm6, %v752_v36  ;;  %1332 = vrot.lane.b32.xlu1 %v2791_v42, %s2477_s6  ;;  %v555_v34 = vld [vmem:[%s2945_s10 + $0x8] sm:$0xff] }
  0xbe   : > { %1178 = vst.msk [vmem:[#allocation2 + $0x8] sm:$0xff] %vm296_vm3, %v2639_v16  ;;  %745 = vrot.lane.b32.xlu0 %v740_v31, %s2477_s6  ;;  %2205 = vmatpush3.bf16.msk.msra.mxu1 %vm2590_vm2, %v2588_v2 }
  0xbf   : > { %v362_v17 = vpop.permute.xlu1 %361  ;;  %v514_v40 = vld [vmem:[#allocation2 + $0x38] sm:$0xff] }
  0xc0   : > { %v688_v37 = vpop.permute.xlu0 %687  ;;  %v513_v39 = vld [vmem:[#allocation2 + $0x30] sm:$0xff]  ;;  %402 = vst.msk [vmem:[#allocation2 + $0x40] sm:$0xff] %vm393_vm4, %v362_v17 }
  0xc1   : > { %727 = vst.msk [vmem:[#allocation2 + $0x10] sm:$0xff] %vm490_vm5, %v688_v37  ;;  %2143 = vmatprep.mubr.msk.f32.mxu0 %vm770_vm6, %v513_v39  ;;  %1240 = vrot.lane.b32.xlu1 %v2817_v46, %s2478_s8 }
  0xc2   : > { %547 = vst.msk [vmem:[#allocation2 + $0x38] sm:$0xff] %vm296_vm3, %v2721_v32  ;;  %546 = vst.msk [vmem:[#allocation2 + $0x30] sm:$0xff] %vm296_vm3, %v2707_v29  ;;  %1238 = vrot.lane.b32.xlu0 %v2810_v45, %s2478_s8  ;;  %2144 = vmatmul.mubr.msk.f32.gmra.mrb[6].mxu0 %vm770_vm6, %v514_v40 }
  0xc3   : > { %v364_v2 = vpop.permute.xlu1 %363 }
  0xc4   : > { %v690_v3 = vpop.permute.xlu0 %689  ;;  %403 = vst.msk [vmem:[#allocation2 + $0x48] sm:$0xff] %vm393_vm4, %v364_v2 }
  0xc5   : > { %728 = vst.msk [vmem:[#allocation2 + $0x18] sm:$0xff] %vm490_vm5, %v690_v3  ;;  %1336 = vrot.lane.b32.xlu1 %v2824_v47, %s2477_s6 }
  0xc6   : > { %1334 = vrot.lane.b32.xlu0 %v2827_v48, %s2477_s6 }
  0xc7   : > { %v461_v16 = vpop.permute.xlu1 %460 }
  0xc8   : > { %v459_v42 = vpop.permute.xlu0 %458  ;;  %v753_v43 = vld [vmem:[#allocation2 + $0x10] sm:$0xff]  ;;  %500 = vst.msk [vmem:[#allocation2 + $0x48] sm:$0xff] %vm490_vm5, %v461_v16 }
  0xc9   : > { %499 = vst.msk [vmem:[#allocation2 + $0x40] sm:$0xff] %vm490_vm5, %v459_v42  ;;  %2109 = vmatprep.mubr.msk.f32.mxu1 %vm770_vm6, %v753_v43  ;;  %1244 = vrot.lane.b32.xlu1 %v2871_v55, %s2478_s8 }
  0xca   : > { %1179 = vst.msk [vmem:[#allocation2 + $0x10] sm:$0xff] %vm296_vm3, %v2659_v20  ;;  %1242 = vrot.lane.b32.xlu0 %v2862_v54, %s2478_s8  ;;  %v1272_v54 = vld [vmem:[%s2945_s10 + $0x19] sm:$0xff] }
  0xcb   : > { %v598_v45 = vpop.permute.xlu1 %597 }
  0xcc   : > { %v596_v46 = vpop.permute.xlu0 %595  ;;  %v754_v47 = vld [vmem:[#allocation2 + $0x18] sm:$0xff]  ;;  %634 = vst.msk [vmem:[#allocation2 + $0x28] sm:$0xff] %vm393_vm4, %v598_v45 }
  0xcd   : > { %633 = vst.msk [vmem:[#allocation2 + $0x20] sm:$0xff] %vm393_vm4, %v596_v46  ;;  %2110 = vmatmul.mubr.msk.f32.gmra.mrb[2].mxu1 %vm770_vm6, %v754_v47  ;;  %1340 = vrot.lane.b32.xlu1 %v2878_v56, %s2477_s6 }
  0xce   : > { %1180 = vst.msk [vmem:[#allocation2 + $0x18] sm:$0xff] %vm296_vm3, %v2674_v23  ;;  %1338 = vrot.lane.b32.xlu0 %v2881_v57, %s2477_s6 }
  0xcf   : > { %v366_v20 = vpop.permute.xlu1 %365  ;;  %v3039_v52 = vld [vmem:[#allocation2 + $0x48] sm:$0xff] }
  0xd0   : > { %v692_v48 = vpop.permute.xlu0 %691  ;;  %v3037_v51 = vld [vmem:[#allocation2 + $0x40] sm:$0xff]  ;;  %404 = vst.msk [vmem:[#allocation2 + $0x50] sm:$0xff] %vm393_vm4, %v366_v20 }
  0xd1   : > { %729 = vst.msk [vmem:[#allocation2 + $0x20] sm:$0xff] %vm490_vm5, %v692_v48  ;;  %1280 = vrot.lane.b32.xlu1 %v2972_v24, %s2478_s8 }
  0xd2   : > { %548 = vst.msk [vmem:[#allocation2 + $0x40] sm:$0xff] %vm296_vm3, %v2744_v35  ;;  %549 = vst.msk [vmem:[#allocation2 + $0x48] sm:$0xff] %vm296_vm3, %v2759_v38  ;;  %1278 = vrot.lane.b32.xlu0 %v2954_v14, %s2478_s8 }
  0xd3   : > { %v368_v23 = vpop.permute.xlu1 %367 }
  0xd4   : > { %v694_v53 = vpop.permute.xlu0 %693  ;;  %405 = vst.msk [vmem:[#allocation2 + $0x58] sm:$0xff] %vm393_vm4, %v368_v23 }
  0xd5   : > { %730 = vst.msk [vmem:[#allocation2 + $0x28] sm:$0xff] %vm490_vm5, %v694_v53  ;;  %1376 = vrot.lane.b32.xlu1 %v740_v31, %s2477_s6 }
  0xd6   : > { %1374 = vrot.lane.b32.xlu0 %v2969_v22, %s2477_s6 }
  0xd7   : > { %v465_v55 = vpop.permute.xlu1 %464 }
  0xd8   : > { %v463_v56 = vpop.permute.xlu0 %462  ;;  %v755_v57 = vld [vmem:[#allocation2 + $0x20] sm:$0xff]  ;;  %502 = vst.msk [vmem:[#allocation2 + $0x58] sm:$0xff] %vm490_vm5, %v465_v55 }
  0xd9   : > { %501 = vst.msk [vmem:[#allocation2 + $0x50] sm:$0xff] %vm490_vm5, %v463_v56  ;;  %2112 = vmatprep.mubr.msk.f32.mxu1 %vm770_vm6, %v755_v57  ;;  %1284 = vrot.lane.b32.xlu1 %v1273_v58, %s2478_s8 }
  0xda   : > { %1181 = vst.msk [vmem:[#allocation2 + $0x20] sm:$0xff] %vm296_vm3, %v2707_v29  ;;  %1282 = vrot.lane.b32.xlu0 %v1272_v54, %s2478_s8  ;;  %s241_s8 = sand.u32 1, %s2450_s13  }
  0xdb   : > { %v602_v60 = vpop.permute.xlu1 %601  ;;  %s1878_s5 = sshll.u32 %s241_s8, 7  ;;  %s3257_s16 = scalar_lea.sflag [#allocation4], %s241_s8 }
  0xdc   : > { %v600_v61 = vpop.permute.xlu0 %599  ;;  %v756_v62 = vld [vmem:[#allocation2 + $0x28] sm:$0xff]  ;;  %636 = vst.msk [vmem:[#allocation2 + $0x38] sm:$0xff] %vm393_vm4, %v602_v60  ;;  %s3219_s7 = scalar_lea.vmem [#allocation3], %s1878_s5 }
  0xdd   : > { %635 = vst.msk [vmem:[#allocation2 + $0x30] sm:$0xff] %vm393_vm4, %v600_v61  ;;  %2113 = vmatmul.mubr.msk.f32.gmra.mrb[4].mxu1 %vm770_vm6, %v756_v62  ;;  %1380 = vrot.lane.b32.xlu1 %v1369_v63, %s2477_s6  ;;  %s1765_s27 = sshll.u32 %s3219_s7, 4  ;;  %s3251_s27 = int_to_ptr.vmem [resolvable:$true] %s1765_s27 }
  0xde   : > { %1182 = vst.msk [vmem:[#allocation2 + $0x28] sm:$0xff] %vm296_vm3, %v2721_v32  ;;  %1378 = vrot.lane.b32.xlu0 %v1368_v59, %s2477_s6  ;;  %s2380_s9 = scalar_lea.vmem %s3251_s27, 2048 }
  0xdf   : > { %v370_v29 = vpop.permute.xlu1 %369  ;;  %v3076_v4 = vld [vmem:[#allocation2 + $0x58] sm:$0xff]  ;;  %p2381_p1 = scmp.ne.s32.totalorder %s3251_s27, %s2380_s9 }
  0xe0   : > { %v696_v0 = vpop.permute.xlu0 %695  ;;  %v3074_v1 = vld [vmem:[#allocation2 + $0x50] sm:$0xff]  ;;  %406 = vst.msk [vmem:[#allocation2 + $0x60] sm:$0xff] %vm393_vm4, %v370_v29  ;;  %v1191_v29 = vld [vmem:[%s2945_s10 + $0x18] sm:$0xff] }
  0xe1   : > { %731 = vst.msk [vmem:[#allocation2 + $0x30] sm:$0xff] %vm490_vm5, %v696_v0  ;;  %p2382_p2 = pnand %p2381_p1, %p2552_p3 }
  0xe2   : > { %550 = vst.msk [vmem:[#allocation2 + $0x50] sm:$0xff] %vm296_vm3, %v2782_v41  ;;  %551 = vst.msk [vmem:[#allocation2 + $0x58] sm:$0xff] %vm296_vm3, %v2797_v44 }
  0xe3   : > { %v372_v32 = vpop.permute.xlu1 %371  ;;  %p2383_p4 = pneg %p2382_p2 }
  0xe4   : > { %v698_v5 = vpop.permute.xlu0 %697  ;;  %407 = vst.msk [vmem:[#allocation2 + $0x68] sm:$0xff] %vm393_vm4, %v372_v32 }
  0xe5   : > { %732 = vst.msk [vmem:[#allocation2 + $0x38] sm:$0xff] %vm490_vm5, %v698_v5 }
  0xe7   : > { %v469_v6 = vpop.permute.xlu1 %468 }
  0xe8   : > { %v467_v7 = vpop.permute.xlu0 %466  ;;  %v757_v8 = vld [vmem:[#allocation2 + $0x30] sm:$0xff]  ;;  %504 = vst.msk [vmem:[#allocation2 + $0x68] sm:$0xff] %vm490_vm5, %v469_v6 }
  0xe9   : > { %503 = vst.msk [vmem:[#allocation2 + $0x60] sm:$0xff] %vm490_vm5, %v467_v7  ;;  %2115 = vmatprep.mubr.msk.f32.mxu1 %vm770_vm6, %v757_v8 }
  0xea   : > { %1183 = vst.msk [vmem:[#allocation2 + $0x30] sm:$0xff] %vm296_vm3, %v2744_v35 }
  0xeb   : > { %v1223_v9 = vpop.permute.xlu1 %1222 }
  0xec   : > { %v604_v10 = vpop.permute.xlu0 %603  ;;  %v758_v11 = vld [vmem:[#allocation2 + $0x38] sm:$0xff]  ;;  %1258 = vst.msk [vmem:[#allocation2] sm:$0xff] %vm393_vm4, %v1223_v9  ;;  %v1192_v9 = vld [vmem:[%s2945_s10 + $0x20] sm:$0xff]  ;;  %s2384_s10 = sshll.u32 %s2479_s4, 4  ;;  %s2385_s10 = int_to_ptr.vmem [resolvable:$false] %s2384_s10 }
  0xed   : > { %637 = vst.msk [vmem:[#allocation2 + $0x40] sm:$0xff] %vm393_vm4, %v604_v10  ;;  %2116 = vmatmul.mubr.msk.f32.gmra.mrb[6].mxu1 %vm770_vm6, %v758_v11  ;;  %s2386_s5 = scalar_lea.vmem %s2385_s10, 4096  ;;  %p2387_p5 = scmp.lt.s32.totalorder %s3251_s27, %s2385_s10 }
  0xee   : > { %1184 = vst.msk [vmem:[#allocation2 + $0x38] sm:$0xff] %vm296_vm3, %v2759_v38  ;;  %p2388_p6 = scmp.lt.s32.totalorder %s2386_s5, %s2380_s9 }
  0xef   : > { %v700_v12 = vpop.permute.xlu1 %699  ;;  %v3098_v15 = vld [vmem:[#allocation2 + $0x68] sm:$0xff] }
  0xf0   : > { %v606_v13 = vpop.permute.xlu0 %605  ;;  %v3096_v14 = vld [vmem:[#allocation2 + $0x60] sm:$0xff]  ;;  %733 = vst.msk [vmem:[#allocation2 + $0x40] sm:$0xff] %vm490_vm5, %v700_v12  ;;  %p2389_p7 = por %p2388_p6, %p2387_p5 }
  0xf1   : > { %638 = vst.msk [vmem:[#allocation2 + $0x48] sm:$0xff] %vm393_vm4, %v606_v13 }
  0xf2   : > { %552 = vst.msk [vmem:[#allocation2 + $0x60] sm:$0xff] %vm296_vm3, %v2834_v49  ;;  %553 = vst.msk [vmem:[#allocation2 + $0x68] sm:$0xff] %vm296_vm3, %v2843_v50  ;;  %p2390_p9 = pnand %p2389_p7, %p2383_p4 }
  0xf3   : > { %v1319_v35 = vpop.permute.xlu1 %1318 }
  0xf4   : > { %v1225_v18 = vpop.permute.xlu0 %1224  ;;  %1354 = vst.msk [vmem:[#allocation2] sm:$0xff] %vm490_vm5, %v1319_v35 }
  0xf5   : > { %1259 = vst.msk [vmem:[#allocation2 + $0x8] sm:$0xff] %vm393_vm4, %v1225_v18 }
  0xf7   : > { %v702_v38 = vpop.permute.xlu1 %701  ;;  %v759_v21 = vld [vmem:[#allocation2 + $0x40] sm:$0xff] }
  0xf8   : > { %v374_v19 = vpop.permute.xlu0 %373  ;;  %734 = vst.msk [vmem:[#allocation2 + $0x48] sm:$0xff] %vm490_vm5, %v702_v38  ;;  %2118 = vmatprep.mubr.msk.f32.mxu1 %vm770_vm6, %v759_v21 }
  0xf9   : > { %408 = vst.msk [vmem:[#allocation2 + $0x70] sm:$0xff] %vm393_vm4, %v374_v19 }
  0xfa   : > { %1185 = vst.msk [vmem:[#allocation2 + $0x40] sm:$0xff] %vm296_vm3, %v2782_v41 }
  0xfb   : > { %v376_v22 = vpop.permute.xlu1 %375  ;;  %v1390_v25 = vld [vmem:[#allocation2] sm:$0xff] }
  0xfc   : > { %v1321_v24 = vpop.permute.xlu0 %1320  ;;  %409 = vst.msk [vmem:[#allocation2 + $0x78] sm:$0xff] %vm393_vm4, %v376_v22  ;;  %2162 = vmatprep.mubr.msk.f32.mxu0 %vm770_vm6, %v1390_v25 }
  0xfd   : > { %1355 = vst.msk [vmem:[#allocation2 + $0x8] sm:$0xff] %vm490_vm5, %v1321_v24 }
  0xff   : > { %v473_v26 = vpop.permute.xlu1 %472  ;;  %v760_v28 = vld [vmem:[#allocation2 + $0x48] sm:$0xff] }
 0x100   : > { %v471_v27 = vpop.permute.xlu0 %470  ;;  %506 = vst.msk [vmem:[#allocation2 + $0x78] sm:$0xff] %vm490_vm5, %v473_v26  ;;  %2119 = vmatmul.mubr.msk.f32.gmra.mrb[8].mxu1 %vm770_vm6, %v760_v28 }
 0x101   : > { %505 = vst.msk [vmem:[#allocation2 + $0x70] sm:$0xff] %vm490_vm5, %v471_v27 }
 0x102   : > { %1186 = vst.msk [vmem:[#allocation2 + $0x48] sm:$0xff] %vm296_vm3, %v2797_v44 }
 0x103   : > { %v1227_v41 = vpop.permute.xlu1 %1226 }
 0x104   : > { %v608_v30 = vpop.permute.xlu0 %607  ;;  %v1391_v31 = vld [vmem:[#allocation2 + $0x8] sm:$0xff]  ;;  %1260 = vst.msk [vmem:[#allocation2 + $0x10] sm:$0xff] %vm393_vm4, %v1227_v41 }
 0x105   : > { %639 = vst.msk [vmem:[#allocation2 + $0x50] sm:$0xff] %vm393_vm4, %v608_v30  ;;  %2163 = vmatmul.mubr.msk.f32.vlgmr.msra.gmra.mrb[0].mxu0 %vm770_vm6, %v1391_v31 }
 0x107   : > { %v704_v36 = vpop.permute.xlu1 %703  ;;  %v3128_v39 = vld [vmem:[#allocation2 + $0x78] sm:$0xff] }
 0x108   : > { %v610_v17 = vpop.permute.xlu0 %609  ;;  %v3126_v37 = vld [vmem:[#allocation2 + $0x70] sm:$0xff]  ;;  %735 = vst.msk [vmem:[#allocation2 + $0x50] sm:$0xff] %vm490_vm5, %v704_v36 }
 0x109   : > { %640 = vst.msk [vmem:[#allocation2 + $0x58] sm:$0xff] %vm393_vm4, %v610_v17 }
 0x10a   : > { %557 = vst.msk [vmem:[#allocation2 + $0x70] sm:$0xff] %vm296_vm3, %v554_v33  ;;  %558 = vst.msk [vmem:[#allocation2 + $0x78] sm:$0xff] %vm296_vm3, %v555_v34 }
 0x10b   : > { %v1323_v44 = vpop.permute.xlu1 %1322 }
 0x10c   : > { %v1229_v40 = vpop.permute.xlu0 %1228  ;;  %1356 = vst.msk [vmem:[#allocation2 + $0x10] sm:$0xff] %vm490_vm5, %v1323_v44 }
 0x10d   : > { %1261 = vst.msk [vmem:[#allocation2 + $0x18] sm:$0xff] %vm393_vm4, %v1229_v40 }
 0x10f   : > { %v1325_v2 = vpop.permute.xlu1 %1324  ;;  %v761_v16 = vld [vmem:[#allocation2 + $0x50] sm:$0xff] }
 0x110   : > { %v706_v3 = vpop.permute.xlu0 %705  ;;  %1357 = vst.msk [vmem:[#allocation2 + $0x18] sm:$0xff] %vm490_vm5, %v1325_v2  ;;  %2121 = vmatprep.mubr.msk.f32.mxu1 %vm770_vm6, %v761_v16 }
 0x111   : > { %736 = vst.msk [vmem:[#allocation2 + $0x58] sm:$0xff] %vm490_vm5, %v706_v3 }
 0x112   : > { %1187 = vst.msk [vmem:[#allocation2 + $0x50] sm:$0xff] %vm296_vm3, %v2834_v49 }
 0x113   : > { %v1231_v42 = vpop.permute.xlu1 %1230  ;;  %v1392_v45 = vld [vmem:[#allocation2 + $0x10] sm:$0xff] }
 0x114   : > { %v612_v43 = vpop.permute.xlu0 %611  ;;  %1262 = vst.msk [vmem:[#allocation2 + $0x20] sm:$0xff] %vm393_vm4, %v1231_v42  ;;  %2165 = vmatprep.mubr.msk.f32.mxu0 %vm770_vm6, %v1392_v45 }
 0x115   : > { %641 = vst.msk [vmem:[#allocation2 + $0x60] sm:$0xff] %vm393_vm4, %v612_v43 }
 0x117   : > { %v708_v46 = vpop.permute.xlu1 %707  ;;  %v1393_v48 = vld [vmem:[#allocation2 + $0x18] sm:$0xff] }
 0x118   : > { %v614_v47 = vpop.permute.xlu0 %613  ;;  %v762_v20 = vld [vmem:[#allocation2 + $0x58] sm:$0xff]  ;;  %737 = vst.msk [vmem:[#allocation2 + $0x60] sm:$0xff] %vm490_vm5, %v708_v46  ;;  %2166 = vmatmul.mubr.msk.f32.gmra.mrb[2].mxu0 %vm770_vm6, %v1393_v48 }
 0x119   : > { %642 = vst.msk [vmem:[#allocation2 + $0x68] sm:$0xff] %vm393_vm4, %v614_v47  ;;  %2122 = vmatmul.mubr.msk.f32.gmra.mrb[10].mxu1 %vm770_vm6, %v762_v20 }
 0x11a   : > { %1188 = vst.msk [vmem:[#allocation2 + $0x58] sm:$0xff] %vm296_vm3, %v2843_v50 }
 0x11b   : > { %v1327_v49 = vpop.permute.xlu1 %1326 }
 0x11c   : > { %v1233_v23 = vpop.permute.xlu0 %1232  ;;  %1358 = vst.msk [vmem:[#allocation2 + $0x20] sm:$0xff] %vm490_vm5, %v1327_v49 }
 0x11d   : > { %1263 = vst.msk [vmem:[#allocation2 + $0x28] sm:$0xff] %vm393_vm4, %v1233_v23 }
 0x11f   : > { %v1329_v53 = vpop.permute.xlu1 %1328  ;;  %v763_v55 = vld [vmem:[#allocation2 + $0x60] sm:$0xff] }
 0x120   : > { %v710_v54 = vpop.permute.xlu0 %709  ;;  %1359 = vst.msk [vmem:[#allocation2 + $0x28] sm:$0xff] %vm490_vm5, %v1329_v53  ;;  %2124 = vmatprep.mubr.msk.f32.mxu1 %vm770_vm6, %v763_v55 }
 0x121   : > { %738 = vst.msk [vmem:[#allocation2 + $0x68] sm:$0xff] %vm490_vm5, %v710_v54 }
 0x122   : > { %1194 = vst.msk [vmem:[#allocation2 + $0x60] sm:$0xff] %vm296_vm3, %v554_v33 }
 0x123   : > { %v1235_v56 = vpop.permute.xlu1 %1234  ;;  %v1394_v50 = vld [vmem:[#allocation2 + $0x20] sm:$0xff] }
 0x124   : > { %v648_v57 = vpop.permute.xlu0 %647  ;;  %1264 = vst.msk [vmem:[#allocation2 + $0x30] sm:$0xff] %vm393_vm4, %v1235_v56  ;;  %2168 = vmatprep.mubr.msk.f32.mxu0 %vm770_vm6, %v1394_v50 }
 0x125   : > { %653 = vst.msk [vmem:[#allocation2 + $0x70] sm:$0xff] %vm393_vm4, %v648_v57 }
 0x127   : > { %v744_v58 = vpop.permute.xlu1 %743  ;;  %v1395_v61 = vld [vmem:[#allocation2 + $0x28] sm:$0xff] }
 0x128   : > { %v650_v59 = vpop.permute.xlu0 %649  ;;  %v764_v60 = vld [vmem:[#allocation2 + $0x68] sm:$0xff]  ;;  %749 = vst.msk [vmem:[#allocation2 + $0x70] sm:$0xff] %vm490_vm5, %v744_v58  ;;  %2169 = vmatmul.mubr.msk.f32.gmra.mrb[4].mxu0 %vm770_vm6, %v1395_v61 }
 0x129   : > { %654 = vst.msk [vmem:[#allocation2 + $0x78] sm:$0xff] %vm393_vm4, %v650_v59  ;;  %2125 = vmatmul.mubr.msk.f32.gmra.mrb[12].mxu1 %vm770_vm6, %v764_v60 }
 0x12a   : > { %1195 = vst.msk [vmem:[#allocation2 + $0x68] sm:$0xff] %vm296_vm3, %v555_v34 }
 0x12b   : > { %v1331_v62 = vpop.permute.xlu1 %1330 }
 0x12c   : > { %v1237_v63 = vpop.permute.xlu0 %1236  ;;  %1360 = vst.msk [vmem:[#allocation2 + $0x30] sm:$0xff] %vm490_vm5, %v1331_v62 }
 0x12d   : > { %1265 = vst.msk [vmem:[#allocation2 + $0x38] sm:$0xff] %vm393_vm4, %v1237_v63 }
 0x12f   : > { %v1333_v0 = vpop.permute.xlu1 %1332  ;;  %v765_v5 = vld [vmem:[#allocation2 + $0x70] sm:$0xff] }
 0x130   : > { %v746_v32 = vpop.permute.xlu0 %745  ;;  %1361 = vst.msk [vmem:[#allocation2 + $0x38] sm:$0xff] %vm490_vm5, %v1333_v0  ;;  %2127 = vmatprep.mubr.msk.f32.mxu1 %vm770_vm6, %v765_v5 }
 0x131   : > { %750 = vst.msk [vmem:[#allocation2 + $0x78] sm:$0xff] %vm490_vm5, %v746_v32 }
 0x132   : > { %1196 = vst.msk [vmem:[#allocation2 + $0x70] sm:$0xff] %vm296_vm3, %v1191_v29 }
 0x133   : > { %v1396_v7 = vld [vmem:[#allocation2 + $0x30] sm:$0xff]  ;;  %v1241_v8 = vpop.permute.xlu1 %1240 }
 0x134   : > { %v1239_v6 = vpop.permute.xlu0 %1238  ;;  %2171 = vmatprep.mubr.msk.f32.mxu0 %vm770_vm6, %v1396_v7  ;;  %1267 = vst.msk [vmem:[#allocation2 + $0x48] sm:$0xff] %vm393_vm4, %v1241_v8 }
 0x135   : > { %1266 = vst.msk [vmem:[#allocation2 + $0x40] sm:$0xff] %vm393_vm4, %v1239_v6 }
 0x137   : > { %v1397_v12 = vld [vmem:[#allocation2 + $0x38] sm:$0xff]  ;;  %v1337_v13 = vpop.permute.xlu1 %1336 }
 0x138   : > { %v1335_v10 = vpop.permute.xlu0 %1334  ;;  %v766_v11 = vld [vmem:[#allocation2 + $0x78] sm:$0xff]  ;;  %2172 = vmatmul.mubr.msk.f32.gmra.mrb[6].mxu0 %vm770_vm6, %v1397_v12  ;;  %1363 = vst.msk [vmem:[#allocation2 + $0x48] sm:$0xff] %vm490_vm5, %v1337_v13 }
 0x139   : > { %1362 = vst.msk [vmem:[#allocation2 + $0x40] sm:$0xff] %vm490_vm5, %v1335_v10  ;;  %2128 = vmatmul.mubr.msk.f32.gmra.mrb[14].mxu1 %vm770_vm6, %v766_v11 }
 0x13a   : > { %1197 = vst.msk [vmem:[#allocation2 + $0x78] sm:$0xff] %vm296_vm3, %v1192_v9  ;;  %2146 = vmatprep.mubr.msk.f32.mxu1 %vm770_vm6, %v3037_v51 }
 0x13b   : > { %v1245_v18 = vpop.permute.xlu1 %1244 }
 0x13c   : > { %v1243_v35 = vpop.permute.xlu0 %1242  ;;  %1269 = vst.msk [vmem:[#allocation2 + $0x58] sm:$0xff] %vm393_vm4, %v1245_v18 }
 0x13d   : > { %1268 = vst.msk [vmem:[#allocation2 + $0x50] sm:$0xff] %vm393_vm4, %v1243_v35  ;;  %2147 = vmatmul.mubr.msk.f32.vlgmr.msra.gmra.mrb[8].mxu1 %vm770_vm6, %v3039_v52 }
 0x13e   : > { %2149 = vmatprep.mubr.msk.f32.mxu1 %vm770_vm6, %v3074_v1 }
 0x13f   : > { %v1341_v21 = vpop.permute.xlu1 %1340  ;;  %v1399_v51 = vld [vmem:[#allocation2 + $0x48] sm:$0xff] }
 0x140   : > { %v1339_v38 = vpop.permute.xlu0 %1338  ;;  %v1398_v19 = vld [vmem:[#allocation2 + $0x40] sm:$0xff]  ;;  %1365 = vst.msk [vmem:[#allocation2 + $0x58] sm:$0xff] %vm490_vm5, %v1341_v21 }
 0x141   : > { %1364 = vst.msk [vmem:[#allocation2 + $0x50] sm:$0xff] %vm490_vm5, %v1339_v38  ;;  %2150 = vmatmul.mubr.msk.f32.gmra.mrb[10].mxu1 %vm770_vm6, %v3076_v4  ;;  %2174 = vmatprep.mubr.msk.f32.mxu0 %vm770_vm6, %v1398_v19 }
 0x142   : > { %2152 = vmatprep.mubr.msk.f32.mxu1 %vm770_vm6, %v3096_v14  ;;  %2175 = vmatmul.mubr.msk.f32.gmra.mrb[8].mxu0 %vm770_vm6, %v1399_v51 }
 0x143   : > { %v1281_v1 = vpop.permute.xlu1 %1280 }
 0x144   : > { %v1279_v52 = vpop.permute.xlu0 %1278  ;;  %1291 = vst.msk [vmem:[#allocation2 + $0x68] sm:$0xff] %vm393_vm4, %v1281_v1 }
 0x145   : > { %1290 = vst.msk [vmem:[#allocation2 + $0x60] sm:$0xff] %vm393_vm4, %v1279_v52  ;;  %2153 = vmatmul.mubr.msk.f32.gmra.mrb[12].mxu1 %vm770_vm6, %v3098_v15 }
 0x146   : > { %2155 = vmatprep.mubr.msk.f32.mxu1 %vm770_vm6, %v3126_v37 }
 0x147   : > { %v1377_v24 = vpop.permute.xlu1 %1376  ;;  %v1401_v14 = vld [vmem:[#allocation2 + $0x58] sm:$0xff] }
 0x148   : > { %v1375_v4 = vpop.permute.xlu0 %1374  ;;  %v1400_v22 = vld [vmem:[#allocation2 + $0x50] sm:$0xff]  ;;  %1387 = vst.msk [vmem:[#allocation2 + $0x68] sm:$0xff] %vm490_vm5, %v1377_v24 }
 0x149   : > { %1386 = vst.msk [vmem:[#allocation2 + $0x60] sm:$0xff] %vm490_vm5, %v1375_v4  ;;  %2156 = vmatmul.mubr.msk.f32.gmra.mrb[14].mxu1 %vm770_vm6, %v3128_v39  ;;  %2177 = vmatprep.mubr.msk.f32.mxu0 %vm770_vm6, %v1400_v22 }
 0x14a   : > { %2178 = vmatmul.mubr.msk.f32.gmra.mrb[10].mxu0 %vm770_vm6, %v1401_v14 }
 0x14b   : > { %v1285_v25 = vpop.permute.xlu1 %1284 }
 0x14c   : > { %v1283_v15 = vpop.permute.xlu0 %1282  ;;  %1293 = vst.msk [vmem:[#allocation2 + $0x78] sm:$0xff] %vm393_vm4, %v1285_v25 }
 0x14d   : > { %1292 = vst.msk [vmem:[#allocation2 + $0x70] sm:$0xff] %vm393_vm4, %v1283_v15 }
 0x14f   : > { %v1381_v28 = vpop.permute.xlu1 %1380  ;;  %v1403_v41 = vld [vmem:[#allocation2 + $0x68] sm:$0xff] }
 0x150   : > { %v1379_v26 = vpop.permute.xlu0 %1378  ;;  %v1402_v27 = vld [vmem:[#allocation2 + $0x60] sm:$0xff]  ;;  %1389 = vst.msk [vmem:[#allocation2 + $0x78] sm:$0xff] %vm490_vm5, %v1381_v28 }
 0x151   : > { %1388 = vst.msk [vmem:[#allocation2 + $0x70] sm:$0xff] %vm490_vm5, %v1379_v26  ;;  %2180 = vmatprep.mubr.msk.f32.mxu0 %vm770_vm6, %v1402_v27 }
 0x152   : > { %2181 = vmatmul.mubr.msk.f32.gmra.mrb[12].mxu0 %vm770_vm6, %v1403_v41 }
 0x157   : > { %v1405_v31 = vld [vmem:[#allocation2 + $0x78] sm:$0xff] }
 0x158   : > { %v1404_v30 = vld [vmem:[#allocation2 + $0x70] sm:$0xff] }
 0x159   : > { %2183 = vmatprep.mubr.msk.f32.mxu0 %vm770_vm6, %v1404_v30 }
 0x15a   : > { %2184 = vmatmul.mubr.msk.f32.gmra.mrb[14].mxu0 %vm770_vm6, %v1405_v31 }
 0x190   : > { %v2108_v33 = vpop.f32.mrb[0].mxu1 }
 0x191   : > { %v889_v34 = vpop.f32.mrb[1].mxu1 }
 0x1a0   : > { %v2111_v36 = vpop.f32.mrb[2].mxu1 }
 0x1a1   : > { %v899_v17 = vpop.f32.mrb[3].mxu1 }
 0x1b0   : > { %v2114_v37 = vpop.f32.mrb[4].mxu1 }
 0x1b1   : > { %v909_v39 = vpop.f32.mrb[5].mxu1 }
 0x1c0   : > { %v2117_v44 = vpop.f32.mrb[6].mxu1 }
 0x1c1   : > { %v919_v40 = vpop.f32.mrb[7].mxu1 }
 0x1d8   : > { %v2164_v2 = vpop.f32.mrb[0].mxu0 }
 0x1d9   : > { %v2206_v3 = vadd.f32 %v2164_v2, %v2108_v33  ;;  %v1526_v16 = vpop.f32.mrb[1].mxu0 }
 0x1da   : > { %v2207_v42 = vadd.f32 %v1526_v16, %v889_v34 }
 0x1db   : > { %v2018_v43 = vmul.f32 -1.442695, %v2206_v3 }
 0x1dc   : > { %v2017_v45 = vmul.f32 -1.442695, %v2207_v42 }
 0x1dd   : > { %2316 = vpow2.f32 %v2018_v43 }
 0x1de   : > { %2318 = vpow2.f32 %v2017_v45 }
 0x1e7   : > { %v2317_v46 = vpop.eup %2316 }
 0x1e8   : > { %v2319_v47 = vpop.eup %2318  ;;  %v1670_v20 = vadd.f32 1.0, %v2317_v46 }
 0x1e9   : > { %v1669_v48 = vadd.f32 1.0, %v2319_v47 }
 0x1ea   : > { %2320 = vrcp.f32 %v1670_v20 }
 0x1eb   : > { %2322 = vrcp.f32 %v1669_v48  ;;  %v2167_v49 = vpop.f32.mrb[2].mxu0 }
 0x1ec   : > { %v2208_v23 = vadd.f32 %v2167_v49, %v2111_v36  ;;  %v1536_v53 = vpop.f32.mrb[3].mxu0 }
 0x1ed   : > { %v2209_v54 = vadd.f32 %v1536_v53, %v899_v17 }
 0x1ee   : > { %v2020_v55 = vmul.f32 -1.442695, %v2208_v23 }
 0x1ef   : > { %v2019_v56 = vmul.f32 -1.442695, %v2209_v54 }
 0x1f0   : > { %2324 = vpow2.f32 %v2020_v55 }
 0x1f1   : > { %2326 = vpow2.f32 %v2019_v56 }
 0x1f4   : > { %v2321_v57 = vpop.eup %2320 }
 0x1f5   : > { %v2323_v50 = vpop.eup %2322  ;;  %v1718_v58 = vmul.f32 %v2321_v57, %v2206_v3 }
 0x1f6   : > { %v1717_v59 = vmul.f32 %v2323_v50, %v2207_v42 }
 0x1f7   : > { %1734 = vst [vmem:[%s3219_s7 + $0x8] sm:$0xff] %v1718_v58 }
 0x1f8   : > { %1733 = vst [vmem:[%s3219_s7] sm:$0xff] %v1717_v59 }
 0x1fa   : > { %v2325_v60 = vpop.eup %2324 }
 0x1fb   : > { %v2327_v61 = vpop.eup %2326  ;;  %v1672_v62 = vadd.f32 1.0, %v2325_v60  ;;  %v2170_v63 = vpop.f32.mrb[4].mxu0 }
 0x1fc   : > { %v1671_v29 = vadd.f32 1.0, %v2327_v61  ;;  %v2210_v0 = vadd.f32 %v2170_v63, %v2114_v37  ;;  %v1546_v32 = vpop.f32.mrb[5].mxu0 }
 0x1fd   : > { %2328 = vrcp.f32 %v1672_v62  ;;  %v2211_v5 = vadd.f32 %v1546_v32, %v909_v39 }
 0x1fe   : > { %2330 = vrcp.f32 %v1671_v29  ;;  %v2022_v6 = vmul.f32 -1.442695, %v2210_v0 }
 0x1ff   : > { %v2021_v7 = vmul.f32 -1.442695, %v2211_v5 }
 0x200   : > { %2332 = vpow2.f32 %v2022_v6 }
 0x201   : > { %2334 = vpow2.f32 %v2021_v7 }
 0x207   : > { %v2329_v8 = vpop.eup %2328 }
 0x208   : > { %v2331_v9 = vpop.eup %2330  ;;  %v1720_v10 = vmul.f32 %v2329_v8, %v2208_v23 }
 0x209   : > { %v1719_v11 = vmul.f32 %v2331_v9, %v2209_v54 }
 0x20a   : > { %v2333_v12 = vpop.eup %2332  ;;  %1736 = vst [vmem:[%s3219_s7 + $0x18] sm:$0xff] %v1720_v10 }
 0x20b   : > { %v2335_v13 = vpop.eup %2334  ;;  %1735 = vst [vmem:[%s3219_s7 + $0x10] sm:$0xff] %v1719_v11  ;;  %v1674_v35 = vadd.f32 1.0, %v2333_v12  ;;  %v2173_v18 = vpop.f32.mrb[6].mxu0 }
 0x20c   : > { %v1673_v38 = vadd.f32 1.0, %v2335_v13  ;;  %v2212_v19 = vadd.f32 %v2173_v18, %v2117_v44  ;;  %v1556_v21 = vpop.f32.mrb[7].mxu0 }
 0x20d   : > { %2336 = vrcp.f32 %v1674_v35  ;;  %v2213_v51 = vadd.f32 %v1556_v21, %v919_v40 }
 0x20e   : > { %2338 = vrcp.f32 %v1673_v38  ;;  %v2024_v52 = vmul.f32 -1.442695, %v2212_v19 }
 0x20f   : > { %v2023_v1 = vmul.f32 -1.442695, %v2213_v51 }
 0x210   : > { %v2148_v4 = vpop.f32.mrb[8].mxu1  ;;  %2340 = vpow2.f32 %v2024_v52 }
 0x211   : > { %v1125_v22 = vpop.f32.mrb[9].mxu1  ;;  %2342 = vpow2.f32 %v2023_v1 }
 0x214   : > { %v2151_v24 = vpop.f32.mrb[10].mxu1 }
 0x215   : > { %v1135_v14 = vpop.f32.mrb[11].mxu1  ;;  %v2176_v15 = vpop.f32.mrb[8].mxu0 }
 0x216   : > { %v3225_v25 = vadd.f32 %v2176_v15, %v2148_v4  ;;  %v1566_v26 = vpop.f32.mrb[9].mxu0 }
 0x217   : > { %v3227_v27 = vadd.f32 %v1566_v26, %v1125_v22  ;;  %v2337_v28 = vpop.eup %2336 }
 0x218   : > { %v2026_v41 = vmul.f32 -1.442695, %v3225_v25  ;;  %v2154_v30 = vpop.f32.mrb[12].mxu1  ;;  %v2339_v31 = vpop.eup %2338  ;;  %v1722_v33 = vmul.f32 %v2337_v28, %v2210_v0 }
 0x219   : > { %v2025_v34 = vmul.f32 -1.442695, %v3227_v27  ;;  %v1145_v36 = vpop.f32.mrb[13].mxu1  ;;  %v1721_v17 = vmul.f32 %v2339_v31, %v2211_v5 }
 0x21a   : > { %2344 = vpow2.f32 %v2026_v41  ;;  %v2341_v37 = vpop.eup %2340  ;;  %1738 = vst [vmem:[%s3219_s7 + $0x28] sm:$0xff] %v1722_v33 }
 0x21b   : > { %2346 = vpow2.f32 %v2025_v34  ;;  %v2343_v39 = vpop.eup %2342  ;;  %1737 = vst [vmem:[%s3219_s7 + $0x20] sm:$0xff] %v1721_v17  ;;  %v1676_v44 = vadd.f32 1.0, %v2341_v37 }
 0x21c   : > { %v2157_v40 = vpop.f32.mrb[14].mxu1  ;;  %v1675_v2 = vadd.f32 1.0, %v2343_v39 }
 0x21d   : > { %v1155_v3 = vpop.f32.mrb[15].mxu1  ;;  %v2179_v16 = vpop.f32.mrb[10].mxu0  ;;  %2348 = vrcp.f32 %v1676_v44 }
 0x21e   : > { %v2216_v42 = vadd.f32 %v2179_v16, %v2151_v24  ;;  %v1576_v43 = vpop.f32.mrb[11].mxu0  ;;  %2350 = vrcp.f32 %v1675_v2 }
 0x21f   : > { %v2217_v45 = vadd.f32 %v1576_v43, %v1135_v14 }
 0x220   : > { %v2028_v46 = vmul.f32 -1.442695, %v2216_v42 }
 0x221   : > { %v2027_v47 = vmul.f32 -1.442695, %v2217_v45 }
 0x222   : > { %2352 = vpow2.f32 %v2028_v46 }
 0x223   : > { %2354 = vpow2.f32 %v2027_v47 }
 0x224   : > { %v2345_v20 = vpop.eup %2344 }
 0x225   : > { %v2347_v48 = vpop.eup %2346  ;;  %v1678_v49 = vadd.f32 1.0, %v2345_v20  ;;  %v2182_v23 = vpop.f32.mrb[12].mxu0 }
 0x226   : > { %v1677_v53 = vadd.f32 1.0, %v2347_v48  ;;  %v2218_v54 = vadd.f32 %v2182_v23, %v2154_v30  ;;  %v1586_v55 = vpop.f32.mrb[13].mxu0 }
 0x227   : > { %2356 = vrcp.f32 %v1678_v49  ;;  %v2219_v56 = vadd.f32 %v1586_v55, %v1145_v36  ;;  %v2349_v57 = vpop.eup %2348 }
 0x228   : > { %2358 = vrcp.f32 %v1677_v53  ;;  %v2030_v50 = vmul.f32 -1.442695, %v2218_v54  ;;  %v2351_v58 = vpop.eup %2350  ;;  %v1724_v59 = vmul.f32 %v2349_v57, %v2212_v19 }
 0x229   : > { %v2029_v60 = vmul.f32 -1.442695, %v2219_v56  ;;  %v1723_v61 = vmul.f32 %v2351_v58, %v2213_v51 }
 0x22a   : > { %2360 = vpow2.f32 %v2030_v50  ;;  %1740 = vst [vmem:[%s3219_s7 + $0x38] sm:$0xff] %v1724_v59 }
 0x22b   : > { %2362 = vpow2.f32 %v2029_v60  ;;  %1739 = vst [vmem:[%s3219_s7 + $0x30] sm:$0xff] %v1723_v61 }
 0x22c   : > { %v2353_v62 = vpop.eup %2352 }
 0x22d   : > { %v2355_v63 = vpop.eup %2354  ;;  %v1680_v29 = vadd.f32 1.0, %v2353_v62  ;;  %v2185_v0 = vpop.f32.mrb[14].mxu0 }
 0x22e   : > { %v1679_v32 = vadd.f32 1.0, %v2355_v63  ;;  %v2220_v5 = vadd.f32 %v2185_v0, %v2157_v40  ;;  %v1596_v6 = vpop.f32.mrb[15].mxu0 }
 0x22f   : > { %2364 = vrcp.f32 %v1680_v29  ;;  %v2221_v7 = vadd.f32 %v1596_v6, %v1155_v3 }
 0x230   : > { %2366 = vrcp.f32 %v1679_v32  ;;  %v2032_v8 = vmul.f32 -1.442695, %v2220_v5 }
 0x231   : > { %v2357_v9 = vpop.eup %2356  ;;  %v2031_v10 = vmul.f32 -1.442695, %v2221_v7 }
 0x232   : > { %v2359_v11 = vpop.eup %2358  ;;  %v1726_v12 = vmul.f32 %v2357_v9, %v3225_v25  ;;  %2368 = vpow2.f32 %v2032_v8 }
 0x233   : > { %v1725_v13 = vmul.f32 %v2359_v11, %v3227_v27  ;;  %2370 = vpow2.f32 %v2031_v10 }
 0x234   : > { %v2361_v35 = vpop.eup %2360  ;;  %1742 = vst [vmem:[%s3219_s7 + $0x48] sm:$0xff] %v1726_v12 }
 0x235   : > { %v2363_v18 = vpop.eup %2362  ;;  %1741 = vst [vmem:[%s3219_s7 + $0x40] sm:$0xff] %v1725_v13  ;;  %v1682_v38 = vadd.f32 1.0, %v2361_v35 }
 0x236   : > { %v1681_v19 = vadd.f32 1.0, %v2363_v18 }
 0x237   : > { %2372 = vrcp.f32 %v1682_v38 }
 0x238   : > { %2374 = vrcp.f32 %v1681_v19 }
 0x239   : > { %v2365_v21 = vpop.eup %2364 }
 0x23a   : > { %v2367_v51 = vpop.eup %2366  ;;  %v1728_v52 = vmul.f32 %v2365_v21, %v2216_v42 }
 0x23b   : > { %v1727_v1 = vmul.f32 %v2367_v51, %v2217_v45 }
 0x23c   : > { %v2369_v4 = vpop.eup %2368  ;;  %1744 = vst [vmem:[%s3219_s7 + $0x58] sm:$0xff] %v1728_v52 }
 0x23d   : > { %v2371_v22 = vpop.eup %2370  ;;  %1743 = vst [vmem:[%s3219_s7 + $0x50] sm:$0xff] %v1727_v1  ;;  %v1684_v24 = vadd.f32 1.0, %v2369_v4 }
 0x23e   : > { %v1683_v14 = vadd.f32 1.0, %v2371_v22 }
 0x23f   : > { %2376 = vrcp.f32 %v1684_v24 }
 0x240   : > { %2378 = vrcp.f32 %v1683_v14 }
 0x241   : > { %v2373_v15 = vpop.eup %2372 }
 0x242   : > { %v2375_v25 = vpop.eup %2374  ;;  %v1730_v26 = vmul.f32 %v2373_v15, %v2218_v54 }
 0x243   : > { %v1729_v27 = vmul.f32 %v2375_v25, %v2219_v56 }
 0x244   : > { %1746 = vst [vmem:[%s3219_s7 + $0x68] sm:$0xff] %v1730_v26 }
 0x245   : > { %1745 = vst [vmem:[%s3219_s7 + $0x60] sm:$0xff] %v1729_v27 }
 0x249   : > { %v2377_v28 = vpop.eup %2376 }
 0x24a   : > { %v2379_v41 = vpop.eup %2378  ;;  %v1732_v30 = vmul.f32 %v2377_v28, %v2220_v5 }
 0x24b   : > { %v1731_v31 = vmul.f32 %v2379_v41, %v2221_v7 }
 0x24c   : > { %1748 = vst [vmem:[%s3219_s7 + $0x78] sm:$0xff] %v1732_v30 }
 0x24d   : > { %1747 = vst [vmem:[%s3219_s7 + $0x70] sm:$0xff] %v1731_v31 }
 0x24e   : > { %2393 = shalt.err (!%p2390_p9)
}
 0x24f   : > { %s2394_s8 = scalar_lea.hbm %s3249_s15, 2048  ;;  %s2398_s20 = scalar_lea.hbm %s3313_s3, 8192 }
 0x250   : > { %p2395_p10 = scmp.ne.s32.totalorder %s3249_s15, %s2394_s8  ;;  %p2399_p13 = scmp.lt.u32.totalorder %s3249_s15, %s3313_s3 }
 0x251   : > { %p2400_p0 = scmp.lt.u32.totalorder %s2398_s20, %s2394_s8  ;;  %p2402_p2 = scmp.lt.u32.totalorder %s2394_s8, %s3249_s15 }
 0x252   : > { %p2396_p11 = pnand %p2395_p10, %p2552_p3 }
 0x253   : > { %p2401_p1 = por %p2400_p0, %p2399_p13 }
 0x254   : > { %p2397_p12 = pneg %p2396_p11 }
 0x255   : > { %p2403_p4 = por %p2402_p2, %p2401_p1 }
 0x257   : > { %p2404_p5 = pnand %p2403_p4, %p2397_p12 }
 0x259   : > { %2407 = shalt.err (!%p2404_p5)
}
 0x25a   : > { %s2480_s28 = smov 128  }
 0x25b   : > { %2241 = dma.vmem_to_hbm [thread:$0]  (%p2552_p3), %s3251_s27, 2048, %s3249_s15, %s3257_s16, %s2480_s28, %s2480_s28, %s2477_s6  }
 0x25c PF: > { %p2247_p6 = scmp.ge.s32.totalorder %s2474_s19, 2  ;;  %s1780_s29 = sand.u32 1, %s2446_s12  }
 0x25d   : > { %s1781_s9 = scalar_lea.sflag [#allocation4], %s1780_s29 }
 0x25e   : > { %p2244_p7 = pnand %p2247_p6, %p2561_p8 }
 0x260   : > { %2441 = dma.done.wait (!%p2244_p7), %s1781_s9, 2048  }
 0x261   : > { %2443 = vsyncadd (!%p2244_p7), %s1781_s9, 4294965248  ;;  %s16_s19 = sadd.s32 1, %s2474_s19   ;;  %s3318_s12 = smov %s2450_s13 }
 0x262   : > { %p13_p9 = scmp.ge.s32.totalorder %s16_s19, 6   ;;  %s3319_s13 = smov %s2454_s14 }
 0x263   : > { %s3320_s14 = smov %s2570_s30  ;;  %s3321_s15 = smov %s2466_s17 }
 0x264   : > { %s3322_s16 = smov %s2470_s18  ;;  %s3323_s17 = smov %s3326_s22 }
 0x265   : > { %s3324_s18 = smov %s3330_s23  ;;  %15 = sbr.rel (!%p13_p9) target bundleno = 5 (0x5), region = 76 }
 0x26c   :  { %1786 = vsyncpa [#allocation4], 1 }
 0x26d   :  { %1788 = vsyncpa [#allocation4 + $0x1], 1 }

</bundles_post_ra>
